<compile_context>
chip_gen: v6e
topology: v6e:2x2x1
jax: 0.10.0
libtpu: 0.0.40
codegen_flags: <defaults>
</compile_context>

<pallas_src>
import jax
import jax.numpy as jnp
from jax.experimental import pallas as pl
from jax.experimental.pallas import tpu as pltpu

C_IN_Y = 17      # gating input channels
C_FEAT = 2048    # backbone feature channels
C_OUT = 7        # class_nums
H = W = 7        # spatial size of senet154 features (224x224 input)
HW = H * W       # 49
C_CHUNK = 256    # channel chunk for the streamed pool/fc3 (multiple of 128)


def twod_head_kernel(y_ref, w1_ref, b1_ref, feat_ref, w3_ref, b3_ref, out_ref):
    # y_ref   : (TB, 17)          f32
    # w1_ref  : (17, 2048)        f32   fc1 weight (1x1 conv == dense)
    # b1_ref  : (1, 2048)         f32
    # feat_ref: (TB, 49, 2048)    bf16  NHWC feature map, HW flattened
    # w3_ref  : (2048, 7)         f32   fc3 weight
    # b3_ref  : (1, 7)            f32
    # out_ref : (TB, 7)           f32
    tb = y_ref.shape[0]

    gate = jax.nn.sigmoid(
        jnp.dot(y_ref[...], w1_ref[...], preferred_element_type=jnp.float32)
        + b1_ref[...]
    )  # (TB, 2048)

    # Pool-before-gate (exact): mean over HW (axis=1, the sublane-direction
    # axis of the channels-last block), then gate, then fc3 — all streamed in
    # 256-channel chunks so the bf16->f32 upcast never materializes a full
    # f32 copy of the block and live vregs stay bounded.
    acc = jnp.zeros((tb, C_OUT), jnp.float32)
    for c0 in range(0, C_FEAT, C_CHUNK):
        feat_c = feat_ref[:, :, c0:c0 + C_CHUNK].astype(jnp.float32)  # (TB,49,CH)
        pooled_c = jnp.sum(feat_c, axis=1) * (1.0 / HW)               # (TB,CH)
        acc = acc + jnp.dot(
            pooled_c * gate[:, c0:c0 + C_CHUNK],
            w3_ref[c0:c0 + C_CHUNK, :],
            preferred_element_type=jnp.float32,
        )
    out_ref[...] = acc + b3_ref[...]


def _pick_batch_tile(B):
    # HBM-bound kernel: bigger tiles amortize the ~0.35us fixed per-grid-step
    # overhead and issue larger DMAs.  Keep tiles 8-row aligned, guarantee
    # >=2 grid steps whenever B > 8 (so v7x's two TensorCores both get work
    # under dimension_semantics=("parallel",)), and cap at TB=32 so the
    # double-buffered bf16 feature tile stays ~16 MiB (fits v7x's 64 MiB VMEM
    # and trivially v5e/v6e's 128 MiB).
    if B <= 8:
        # TODO(synk): a cdiv(B, 2) split would engage both v7x TensorCores for
        # tiny batches, but is skipped to keep sublane tiles 8-aligned/full-dim.
        return B
    return min(32, ((pl.cdiv(B, 2) + 7) // 8) * 8)


def twod_model_head(feat_nhwc, y, w1, b1, w3, b3):
    """feat_nhwc: (B, 7, 7, 2048) bfloat16, channels-last as emitted by the
    backbone (no wrapper transpose); y: (B, 17)."""
    B = feat_nhwc.shape[0]
    assert feat_nhwc.shape[1:] == (H, W, C_FEAT), feat_nhwc.shape
    # The kernel is feature-map-bandwidth bound: enforce bf16 at the boundary
    # so an f32 caller can't silently double the dominant HBM read.
    assert feat_nhwc.dtype == jnp.bfloat16, feat_nhwc.dtype

    feat = feat_nhwc.reshape(B, HW, C_FEAT)        # free contiguous reshape
    y2 = y.reshape(B, C_IN_Y).astype(jnp.float32)

    TB = _pick_batch_tile(B)
    grid = (pl.cdiv(B, TB),)

    # Padding-aware scoped-VMEM budget: bf16 tiles pad HW=49 up to 64 sublanes.
    hw_pad = 64
    feat_tile_bytes = TB * hw_pad * C_FEAT * 2                        # bf16
    weight_bytes = 4 * (C_IN_Y * C_FEAT + C_FEAT + C_FEAT * C_OUT + C_OUT)
    small_io_bytes = 4 * (TB * 128) * 2                               # y + out tiles (lane-padded)
    vmem_limit = int(2 * feat_tile_bytes + 2 * weight_bytes
                     + 2 * small_io_bytes + (4 << 20))

    return pl.pallas_call(
        twod_head_kernel,
        out_shape=jax.ShapeDtypeStruct((B, C_OUT), jnp.float32),
        grid=grid,
        in_specs=[
            pl.BlockSpec((TB, C_IN_Y), lambda b: (b, 0)),
            pl.BlockSpec((C_IN_Y, C_FEAT), lambda b: (0, 0)),
            pl.BlockSpec((1, C_FEAT), lambda b: (0, 0)),
            pl.BlockSpec((TB, HW, C_FEAT), lambda b: (b, 0, 0)),
            pl.BlockSpec((C_FEAT, C_OUT), lambda b: (0, 0)),
            pl.BlockSpec((1, C_OUT), lambda b: (0, 0)),
        ],
        out_specs=pl.BlockSpec((TB, C_OUT), lambda b: (b, 0)),
        compiler_params=pltpu.CompilerParams(
            dimension_semantics=("parallel",),
            vmem_limit_bytes=vmem_limit,
        ),
    )(y2, w1, b1, feat, w3, b3)  # -> (B, 7) == x.view(x.size(0), -1)


def init_params(key):
    k1, k2, k3, k4 = jax.random.split(key, 4)
    # fc1: Conv2d(17, 2048, 1) -> weight (2048, 17, 1, 1); stored as (17, 2048)
    w1 = jax.random.normal(k1, (C_IN_Y, C_FEAT), jnp.float32) * 0.05
    b1 = jax.random.normal(k2, (1, C_FEAT), jnp.float32) * 0.05
    # fc3: Conv2d(2048, 7, 1) -> weight (7, 2048, 1, 1); stored as (2048, 7)
    w3 = jax.random.normal(k3, (C_FEAT, C_OUT), jnp.float32) * 0.02
    b3 = jax.random.normal(k4, (1, C_OUT), jnp.float32) * 0.02
    return w1, b1, w3, b3


if __name__ == "__main__":
    key = jax.random.PRNGKey(0)
    kf, ky, kp = jax.random.split(key, 3)

    B = 2
    # Backbone feature map (simulated), channels-last / NHWC, bf16.
    feat = jax.random.normal(kf, (B, H, W, C_FEAT), jnp.float32).astype(jnp.bfloat16)
    y = jax.random.normal(ky, (B, C_IN_Y), jnp.float32)            # 17-dim side input
    w1, b1, w3, b3 = init_params(kp)

    out = jax.block_until_ready(twod_model_head(feat, y, w1, b1, w3, b3))

    # Pure-JAX reference in the ORIGINAL op order (gate -> mul -> avgpool -> fc3).
    gate = jax.nn.sigmoid(y @ w1 + b1)                              # (B, 2048)
    feat_f32 = feat.astype(jnp.float32).reshape(B, HW, C_FEAT)
    pooled = jnp.mean(feat_f32 * gate[:, None, :], axis=1)          # (B, 2048)
    ref = pooled @ w3 + b3

    assert out.shape == (B, C_OUT)
    assert jnp.allclose(out, ref, atol=1e-3, rtol=1e-3), float(
        jnp.max(jnp.abs(out - ref)))

    print("KERNEL_OK")
</pallas_src>

<mosaic_0001>
module attributes {stable_mosaic.version = 11 : i64} {
  func.func @twod_head_kernel(%arg0: i32, %arg1: memref<2x17xf32, #tpu.memory_space<vmem>>, %arg2: memref<17x2048xf32, #tpu.memory_space<vmem>>, %arg3: memref<1x2048xf32, #tpu.memory_space<vmem>>, %arg4: memref<2x49x2048xbf16, #tpu.memory_space<vmem>>, %arg5: memref<2048x7xf32, #tpu.memory_space<vmem>>, %arg6: memref<1x7xf32, #tpu.memory_space<vmem>>, %arg7: memref<2x7xf32, #tpu.memory_space<vmem>>) attributes {dimension_semantics = [#tpu.dimension_semantics<parallel>], iteration_bounds = array<i64: 1>, scalar_prefetch = 0 : i64, scratch_operands = 0 : i64, tpu.core_type = #tpu.core_type<tc>, window_params = [{transform_indices = @transform_0, window_bounds = array<i64: 2, 17>}, {pipeline_mode = #tpu.pipeline_mode<synchronous>, transform_indices = @transform_1, window_bounds = array<i64: 17, 2048>}, {pipeline_mode = #tpu.pipeline_mode<synchronous>, transform_indices = @transform_2, window_bounds = array<i64: 1, 2048>}, {transform_indices = @transform_3, window_bounds = array<i64: 2, 49, 2048>}, {pipeline_mode = #tpu.pipeline_mode<synchronous>, transform_indices = @transform_4, window_bounds = array<i64: 2048, 7>}, {pipeline_mode = #tpu.pipeline_mode<synchronous>, transform_indices = @transform_5, window_bounds = array<i64: 1, 7>}, {transform_indices = @transform_6, window_bounds = array<i64: 2, 7>}]} {
    %c0 = arith.constant 0 : index
    %c0_0 = arith.constant 0 : index
    %0 = vector.load %arg1[%c0, %c0_0] : memref<2x17xf32, #tpu.memory_space<vmem>>, vector<2x17xf32>
    %c0_1 = arith.constant 0 : index
    %c0_2 = arith.constant 0 : index
    %1 = vector.load %arg2[%c0_1, %c0_2] : memref<17x2048xf32, #tpu.memory_space<vmem>>, vector<17x2048xf32>
    %cst = arith.constant dense<0.000000e+00> : vector<2x2048xf32>
    %2 = tpu.matmul %0, %1, %cst {dimension_numbers = #tpu.dot_dimension_numbers<[1], [0], [0], [1], [0, 0, 1, 1], [], []>} : vector<2x17xf32>, vector<17x2048xf32>, vector<2x2048xf32> -> vector<2x2048xf32>
    %c0_3 = arith.constant 0 : index
    %c0_4 = arith.constant 0 : index
    %3 = vector.load %arg3[%c0_3, %c0_4] : memref<1x2048xf32, #tpu.memory_space<vmem>>, vector<1x2048xf32>
    %4 = vector.broadcast %3 : vector<1x2048xf32> to vector<2x2048xf32>
    %5 = arith.addf %2, %4 : vector<2x2048xf32>
    %6 = arith.negf %5 : vector<2x2048xf32>
    %7 = math.exp %6 : vector<2x2048xf32>
    %cst_5 = arith.constant 1.000000e+00 : f32
    %8 = vector.broadcast %cst_5 : f32 to vector<2x2048xf32>
    %9 = arith.addf %8, %7 : vector<2x2048xf32>
    %10 = arith.divf %8, %9 : vector<2x2048xf32>
    %cst_6 = arith.constant 0.000000e+00 : f32
    %11 = vector.broadcast %cst_6 : f32 to vector<2x7xf32>
    %c0_7 = arith.constant 0 : index
    %c0_8 = arith.constant 0 : index
    %c0_9 = arith.constant 0 : index
    %12 = vector.load %arg4[%c0_7, %c0_8, %c0_9] : memref<2x49x2048xbf16, #tpu.memory_space<vmem>>, vector<2x49x256xbf16>
    %13 = arith.extf %12 : vector<2x49x256xbf16> to vector<2x49x256xf32>
    %cst_10 = arith.constant dense<0.000000e+00> : vector<2x256xf32>
    %14 = vector.multi_reduction <add>, %13, %cst_10 [1] : vector<2x49x256xf32> to vector<2x256xf32>
    %cst_11 = arith.constant 0.0204081628 : f32
    %15 = vector.broadcast %cst_11 : f32 to vector<2x256xf32>
    %16 = arith.mulf %14, %15 : vector<2x256xf32>
    %17 = vector.extract_strided_slice %10 {offsets = [0, 0], sizes = [2, 256], strides = [1, 1]} : vector<2x2048xf32> to vector<2x256xf32>
    %18 = arith.mulf %16, %17 : vector<2x256xf32>
    %c0_12 = arith.constant 0 : index
    %c0_13 = arith.constant 0 : index
    %19 = vector.load %arg5[%c0_12, %c0_13] : memref<2048x7xf32, #tpu.memory_space<vmem>>, vector<256x7xf32>
    %cst_14 = arith.constant dense<0.000000e+00> : vector<2x7xf32>
    %20 = tpu.matmul %18, %19, %cst_14 {dimension_numbers = #tpu.dot_dimension_numbers<[1], [0], [0], [1], [0, 0, 1, 1], [], []>} : vector<2x256xf32>, vector<256x7xf32>, vector<2x7xf32> -> vector<2x7xf32>
    %21 = arith.addf %11, %20 : vector<2x7xf32>
    %c0_15 = arith.constant 0 : index
    %c0_16 = arith.constant 0 : index
    %c256 = arith.constant 256 : index
    %22 = vector.load %arg4[%c0_15, %c0_16, %c256] : memref<2x49x2048xbf16, #tpu.memory_space<vmem>>, vector<2x49x256xbf16>
    %23 = arith.extf %22 : vector<2x49x256xbf16> to vector<2x49x256xf32>
    %cst_17 = arith.constant dense<0.000000e+00> : vector<2x256xf32>
    %24 = vector.multi_reduction <add>, %23, %cst_17 [1] : vector<2x49x256xf32> to vector<2x256xf32>
    %cst_18 = arith.constant 0.0204081628 : f32
    %25 = vector.broadcast %cst_18 : f32 to vector<2x256xf32>
    %26 = arith.mulf %24, %25 : vector<2x256xf32>
    %27 = vector.extract_strided_slice %10 {offsets = [0, 256], sizes = [2, 256], strides = [1, 1]} : vector<2x2048xf32> to vector<2x256xf32>
    %28 = arith.mulf %26, %27 : vector<2x256xf32>
    %c256_19 = arith.constant 256 : index
    %c0_20 = arith.constant 0 : index
    %29 = vector.load %arg5[%c256_19, %c0_20] : memref<2048x7xf32, #tpu.memory_space<vmem>>, vector<256x7xf32>
    %cst_21 = arith.constant dense<0.000000e+00> : vector<2x7xf32>
    %30 = tpu.matmul %28, %29, %cst_21 {dimension_numbers = #tpu.dot_dimension_numbers<[1], [0], [0], [1], [0, 0, 1, 1], [], []>} : vector<2x256xf32>, vector<256x7xf32>, vector<2x7xf32> -> vector<2x7xf32>
    %31 = arith.addf %21, %30 : vector<2x7xf32>
    %c0_22 = arith.constant 0 : index
    %c0_23 = arith.constant 0 : index
    %c512 = arith.constant 512 : index
    %32 = vector.load %arg4[%c0_22, %c0_23, %c512] : memref<2x49x2048xbf16, #tpu.memory_space<vmem>>, vector<2x49x256xbf16>
    %33 = arith.extf %32 : vector<2x49x256xbf16> to vector<2x49x256xf32>
    %cst_24 = arith.constant dense<0.000000e+00> : vector<2x256xf32>
    %34 = vector.multi_reduction <add>, %33, %cst_24 [1] : vector<2x49x256xf32> to vector<2x256xf32>
    %cst_25 = arith.constant 0.0204081628 : f32
    %35 = vector.broadcast %cst_25 : f32 to vector<2x256xf32>
    %36 = arith.mulf %34, %35 : vector<2x256xf32>
    %37 = vector.extract_strided_slice %10 {offsets = [0, 512], sizes = [2, 256], strides = [1, 1]} : vector<2x2048xf32> to vector<2x256xf32>
    %38 = arith.mulf %36, %37 : vector<2x256xf32>
    %c512_26 = arith.constant 512 : index
    %c0_27 = arith.constant 0 : index
    %39 = vector.load %arg5[%c512_26, %c0_27] : memref<2048x7xf32, #tpu.memory_space<vmem>>, vector<256x7xf32>
    %cst_28 = arith.constant dense<0.000000e+00> : vector<2x7xf32>
    %40 = tpu.matmul %38, %39, %cst_28 {dimension_numbers = #tpu.dot_dimension_numbers<[1], [0], [0], [1], [0, 0, 1, 1], [], []>} : vector<2x256xf32>, vector<256x7xf32>, vector<2x7xf32> -> vector<2x7xf32>
    %41 = arith.addf %31, %40 : vector<2x7xf32>
    %c0_29 = arith.constant 0 : index
    %c0_30 = arith.constant 0 : index
    %c768 = arith.constant 768 : index
    %42 = vector.load %arg4[%c0_29, %c0_30, %c768] : memref<2x49x2048xbf16, #tpu.memory_space<vmem>>, vector<2x49x256xbf16>
    %43 = arith.extf %42 : vector<2x49x256xbf16> to vector<2x49x256xf32>
    %cst_31 = arith.constant dense<0.000000e+00> : vector<2x256xf32>
    %44 = vector.multi_reduction <add>, %43, %cst_31 [1] : vector<2x49x256xf32> to vector<2x256xf32>
    %cst_32 = arith.constant 0.0204081628 : f32
    %45 = vector.broadcast %cst_32 : f32 to vector<2x256xf32>
    %46 = arith.mulf %44, %45 : vector<2x256xf32>
    %47 = vector.extract_strided_slice %10 {offsets = [0, 768], sizes = [2, 256], strides = [1, 1]} : vector<2x2048xf32> to vector<2x256xf32>
    %48 = arith.mulf %46, %47 : vector<2x256xf32>
    %c768_33 = arith.constant 768 : index
    %c0_34 = arith.constant 0 : index
    %49 = vector.load %arg5[%c768_33, %c0_34] : memref<2048x7xf32, #tpu.memory_space<vmem>>, vector<256x7xf32>
    %cst_35 = arith.constant dense<0.000000e+00> : vector<2x7xf32>
    %50 = tpu.matmul %48, %49, %cst_35 {dimension_numbers = #tpu.dot_dimension_numbers<[1], [0], [0], [1], [0, 0, 1, 1], [], []>} : vector<2x256xf32>, vector<256x7xf32>, vector<2x7xf32> -> vector<2x7xf32>
    %51 = arith.addf %41, %50 : vector<2x7xf32>
    %c0_36 = arith.constant 0 : index
    %c0_37 = arith.constant 0 : index
    %c1024 = arith.constant 1024 : index
    %52 = vector.load %arg4[%c0_36, %c0_37, %c1024] : memref<2x49x2048xbf16, #tpu.memory_space<vmem>>, vector<2x49x256xbf16>
    %53 = arith.extf %52 : vector<2x49x256xbf16> to vector<2x49x256xf32>
    %cst_38 = arith.constant dense<0.000000e+00> : vector<2x256xf32>
    %54 = vector.multi_reduction <add>, %53, %cst_38 [1] : vector<2x49x256xf32> to vector<2x256xf32>
    %cst_39 = arith.constant 0.0204081628 : f32
    %55 = vector.broadcast %cst_39 : f32 to vector<2x256xf32>
    %56 = arith.mulf %54, %55 : vector<2x256xf32>
    %57 = vector.extract_strided_slice %10 {offsets = [0, 1024], sizes = [2, 256], strides = [1, 1]} : vector<2x2048xf32> to vector<2x256xf32>
    %58 = arith.mulf %56, %57 : vector<2x256xf32>
    %c1024_40 = arith.constant 1024 : index
    %c0_41 = arith.constant 0 : index
    %59 = vector.load %arg5[%c1024_40, %c0_41] : memref<2048x7xf32, #tpu.memory_space<vmem>>, vector<256x7xf32>
    %cst_42 = arith.constant dense<0.000000e+00> : vector<2x7xf32>
    %60 = tpu.matmul %58, %59, %cst_42 {dimension_numbers = #tpu.dot_dimension_numbers<[1], [0], [0], [1], [0, 0, 1, 1], [], []>} : vector<2x256xf32>, vector<256x7xf32>, vector<2x7xf32> -> vector<2x7xf32>
    %61 = arith.addf %51, %60 : vector<2x7xf32>
    %c0_43 = arith.constant 0 : index
    %c0_44 = arith.constant 0 : index
    %c1280 = arith.constant 1280 : index
    %62 = vector.load %arg4[%c0_43, %c0_44, %c1280] : memref<2x49x2048xbf16, #tpu.memory_space<vmem>>, vector<2x49x256xbf16>
    %63 = arith.extf %62 : vector<2x49x256xbf16> to vector<2x49x256xf32>
    %cst_45 = arith.constant dense<0.000000e+00> : vector<2x256xf32>
    %64 = vector.multi_reduction <add>, %63, %cst_45 [1] : vector<2x49x256xf32> to vector<2x256xf32>
    %cst_46 = arith.constant 0.0204081628 : f32
    %65 = vector.broadcast %cst_46 : f32 to vector<2x256xf32>
    %66 = arith.mulf %64, %65 : vector<2x256xf32>
    %67 = vector.extract_strided_slice %10 {offsets = [0, 1280], sizes = [2, 256], strides = [1, 1]} : vector<2x2048xf32> to vector<2x256xf32>
    %68 = arith.mulf %66, %67 : vector<2x256xf32>
    %c1280_47 = arith.constant 1280 : index
    %c0_48 = arith.constant 0 : index
    %69 = vector.load %arg5[%c1280_47, %c0_48] : memref<2048x7xf32, #tpu.memory_space<vmem>>, vector<256x7xf32>
    %cst_49 = arith.constant dense<0.000000e+00> : vector<2x7xf32>
    %70 = tpu.matmul %68, %69, %cst_49 {dimension_numbers = #tpu.dot_dimension_numbers<[1], [0], [0], [1], [0, 0, 1, 1], [], []>} : vector<2x256xf32>, vector<256x7xf32>, vector<2x7xf32> -> vector<2x7xf32>
    %71 = arith.addf %61, %70 : vector<2x7xf32>
    %c0_50 = arith.constant 0 : index
    %c0_51 = arith.constant 0 : index
    %c1536 = arith.constant 1536 : index
    %72 = vector.load %arg4[%c0_50, %c0_51, %c1536] : memref<2x49x2048xbf16, #tpu.memory_space<vmem>>, vector<2x49x256xbf16>
    %73 = arith.extf %72 : vector<2x49x256xbf16> to vector<2x49x256xf32>
    %cst_52 = arith.constant dense<0.000000e+00> : vector<2x256xf32>
    %74 = vector.multi_reduction <add>, %73, %cst_52 [1] : vector<2x49x256xf32> to vector<2x256xf32>
    %cst_53 = arith.constant 0.0204081628 : f32
    %75 = vector.broadcast %cst_53 : f32 to vector<2x256xf32>
    %76 = arith.mulf %74, %75 : vector<2x256xf32>
    %77 = vector.extract_strided_slice %10 {offsets = [0, 1536], sizes = [2, 256], strides = [1, 1]} : vector<2x2048xf32> to vector<2x256xf32>
    %78 = arith.mulf %76, %77 : vector<2x256xf32>
    %c1536_54 = arith.constant 1536 : index
    %c0_55 = arith.constant 0 : index
    %79 = vector.load %arg5[%c1536_54, %c0_55] : memref<2048x7xf32, #tpu.memory_space<vmem>>, vector<256x7xf32>
    %cst_56 = arith.constant dense<0.000000e+00> : vector<2x7xf32>
    %80 = tpu.matmul %78, %79, %cst_56 {dimension_numbers = #tpu.dot_dimension_numbers<[1], [0], [0], [1], [0, 0, 1, 1], [], []>} : vector<2x256xf32>, vector<256x7xf32>, vector<2x7xf32> -> vector<2x7xf32>
    %81 = arith.addf %71, %80 : vector<2x7xf32>
    %c0_57 = arith.constant 0 : index
    %c0_58 = arith.constant 0 : index
    %c1792 = arith.constant 1792 : index
    %82 = vector.load %arg4[%c0_57, %c0_58, %c1792] : memref<2x49x2048xbf16, #tpu.memory_space<vmem>>, vector<2x49x256xbf16>
    %83 = arith.extf %82 : vector<2x49x256xbf16> to vector<2x49x256xf32>
    %cst_59 = arith.constant dense<0.000000e+00> : vector<2x256xf32>
    %84 = vector.multi_reduction <add>, %83, %cst_59 [1] : vector<2x49x256xf32> to vector<2x256xf32>
    %cst_60 = arith.constant 0.0204081628 : f32
    %85 = vector.broadcast %cst_60 : f32 to vector<2x256xf32>
    %86 = arith.mulf %84, %85 : vector<2x256xf32>
    %87 = vector.extract_strided_slice %10 {offsets = [0, 1792], sizes = [2, 256], strides = [1, 1]} : vector<2x2048xf32> to vector<2x256xf32>
    %88 = arith.mulf %86, %87 : vector<2x256xf32>
    %c1792_61 = arith.constant 1792 : index
    %c0_62 = arith.constant 0 : index
    %89 = vector.load %arg5[%c1792_61, %c0_62] : memref<2048x7xf32, #tpu.memory_space<vmem>>, vector<256x7xf32>
    %cst_63 = arith.constant dense<0.000000e+00> : vector<2x7xf32>
    %90 = tpu.matmul %88, %89, %cst_63 {dimension_numbers = #tpu.dot_dimension_numbers<[1], [0], [0], [1], [0, 0, 1, 1], [], []>} : vector<2x256xf32>, vector<256x7xf32>, vector<2x7xf32> -> vector<2x7xf32>
    %91 = arith.addf %81, %90 : vector<2x7xf32>
    %c0_64 = arith.constant 0 : index
    %c0_65 = arith.constant 0 : index
    %92 = vector.load %arg6[%c0_64, %c0_65] : memref<1x7xf32, #tpu.memory_space<vmem>>, vector<1x7xf32>
    %93 = vector.broadcast %92 : vector<1x7xf32> to vector<2x7xf32>
    %94 = arith.addf %91, %93 : vector<2x7xf32>
    %c0_66 = arith.constant 0 : index
    %c0_67 = arith.constant 0 : index
    %95 = vector.load %arg7[%c0_66, %c0_67] : memref<2x7xf32, #tpu.memory_space<vmem>>, vector<2x7xf32>
    tpu.vector_store %arg7[%c0_66, %c0_67], %94 {strides = array<i32>} : memref<2x7xf32, #tpu.memory_space<vmem>>, vector<2x7xf32>,
    return
  }
  func.func @transform_0(%arg0: i32) -> (i32, i32) {
    %c0_i32 = arith.constant 0 : i32
    %c0_i32_0 = arith.constant 0 : i32
    return %arg0, %c0_i32 : i32, i32
  }
  func.func @transform_1(%arg0: i32) -> (i32, i32) {
    %c0_i32 = arith.constant 0 : i32
    %c0_i32_0 = arith.constant 0 : i32
    %c0_i32_1 = arith.constant 0 : i32
    return %c0_i32, %c0_i32_0 : i32, i32
  }
  func.func @transform_2(%arg0: i32) -> (i32, i32) {
    %c0_i32 = arith.constant 0 : i32
    %c0_i32_0 = arith.constant 0 : i32
    %c0_i32_1 = arith.constant 0 : i32
    return %c0_i32, %c0_i32_0 : i32, i32
  }
  func.func @transform_3(%arg0: i32) -> (i32, i32, i32) {
    %c0_i32 = arith.constant 0 : i32
    %c0_i32_0 = arith.constant 0 : i32
    %c0_i32_1 = arith.constant 0 : i32
    return %arg0, %c0_i32, %c0_i32_0 : i32, i32, i32
  }
  func.func @transform_4(%arg0: i32) -> (i32, i32) {
    %c0_i32 = arith.constant 0 : i32
    %c0_i32_0 = arith.constant 0 : i32
    %c0_i32_1 = arith.constant 0 : i32
    return %c0_i32, %c0_i32_0 : i32, i32
  }
  func.func @transform_5(%arg0: i32) -> (i32, i32) {
    %c0_i32 = arith.constant 0 : i32
    %c0_i32_0 = arith.constant 0 : i32
    %c0_i32_1 = arith.constant 0 : i32
    return %c0_i32, %c0_i32_0 : i32, i32
  }
  func.func @transform_6(%arg0: i32) -> (i32, i32) {
    %c0_i32 = arith.constant 0 : i32
    %c0_i32_0 = arith.constant 0 : i32
    return %arg0, %c0_i32 : i32, i32
  }
}

</mosaic_0001>

<bundles_post_ra>
// kernel: tpu_custom_call.1
= control target key start
LH: loop header
LB: loop body
LE: loop exit
PB: predicated region body
PF: predicated region fallthrough
CT: control target
= control target key end

     0   :  { %vm161_vm0 = vcmask 1040384   ;;  %vm157_vm1 = vcmask 138240   ;;  %v3090_v13 = vmov 0.0   ;;  %s5386_s0 = inlined_call_operand.vmem [shape: f32[2,17], index: 0, kind: input, shape index: {}]   ;;  %s5387_s1 = inlined_call_operand.vmem [shape: f32[17,2048], index: 1, kind: input, shape index: {}]   ;;  %s5388_s2 = inlined_call_operand.vmem [shape: f32[1,2048], index: 2, kind: input, shape index: {}]   ;;  %s5389_s3 = inlined_call_operand.vmem [shape: bf16[2,49,2048], index: 3, kind: input, shape index: {}]   ;;  %s5390_s4 = inlined_call_operand.vmem [shape: f32[2048,7], index: 4, kind: input, shape index: {}]   ;;  %s5391_s5 = inlined_call_operand.vmem [shape: f32[1,7], index: 5, kind: input, shape index: {}]   ;;  %s5392_s6 = inlined_call_operand.hbm [shape: f32[2,7], index: 6, kind: output, shape index: {}]  }
   0x1   :  { %v58_v0 = vld [vmem:[%s5387_s1 + $0x108] sm:$0x1]  ;;  %v60_v1 = vld [vmem:[%s5387_s1 + $0x118] sm:$0x1]  ;;  %v57_v3 = vld [vmem:[%s5387_s1 + $0x100] sm:$0x1]  ;;  %274 = vmatprep.mubr.f32.mxu0 %v3090_v13  ;;  %345 = vmatprep.mubr.f32.mxu1 %v3090_v13 }
   0x2   :  { %v42_v2 = vld [vmem:[%s5387_s1 + $0x88] sm:$0xff]  ;;  %2681 = vmatprep.subr.msk.mxu0 %vm161_vm0, %v58_v0  ;;  %2684 = vmatprep.subr.msk.mxu1 %vm161_vm0, %v60_v1  ;;  %v59_v4 = vld [vmem:[%s5387_s1 + $0x110] sm:$0x1]  ;;  %v44_v5 = vld [vmem:[%s5387_s1 + $0x98] sm:$0xff] }
   0x3   :  { %2682 = vmatpush1.msk.msra.mxu0 %vm161_vm0, %v57_v3  ;;  %2685 = vmatpush1.msk.msra.mxu1 %vm161_vm0, %v59_v4  ;;  %v41_v6 = vld [vmem:[%s5387_s1 + $0x80] sm:$0xff]  ;;  %v43_v7 = vld [vmem:[%s5387_s1 + $0x90] sm:$0xff]  ;;  %v26_v8 = vld [vmem:[%s5387_s1 + $0x8] sm:$0xff] }
   0x4   :  { %238 = vmatprep.subr.mxu0 %v42_v2  ;;  %309 = vmatprep.subr.mxu1 %v44_v5  ;;  %v28_v9 = vld [vmem:[%s5387_s1 + $0x18] sm:$0xff]  ;;  %v25_v10 = vld [vmem:[%s5387_s1] sm:$0xff]  ;;  %v27_v11 = vld [vmem:[%s5387_s1 + $0x10] sm:$0xff] }
   0x5   :  { %239 = vmatpush1.msra.mxu0 %v41_v6  ;;  %310 = vmatpush1.msra.mxu1 %v43_v7  ;;  %v3170_v12 = vld [vmem:[%s5386_s0] sm:$0x3]  ;;  %v62_v14 = vld [vmem:[%s5387_s1 + $0x128] sm:$0x1]  ;;  %v64_v15 = vld [vmem:[%s5387_s1 + $0x138] sm:$0x1] }
   0x6   :  { %240 = vmatprep.subr.mxu0 %v26_v8  ;;  %311 = vmatprep.subr.mxu1 %v28_v9  ;;  %v61_v16 = vld [vmem:[%s5387_s1 + $0x120] sm:$0x1]  ;;  %v63_v17 = vld [vmem:[%s5387_s1 + $0x130] sm:$0x1]  ;;  %v46_v18 = vld [vmem:[%s5387_s1 + $0xa8] sm:$0xff] }
   0x7   :  { %241 = vmatpush1.msra.mxu0 %v25_v10  ;;  %312 = vmatpush1.msra.mxu1 %v27_v11  ;;  %v48_v19 = vld [vmem:[%s5387_s1 + $0xb8] sm:$0xff]  ;;  %v45_v20 = vld [vmem:[%s5387_s1 + $0xa0] sm:$0xff]  ;;  %v30_v21 = vld [vmem:[%s5387_s1 + $0x28] sm:$0xff] }
   0x8   :  { %2683 = vmatmul.mubr.msk.f32.vlgmr.msra.gmra.mxu0 %vm157_vm1, %v3170_v12  ;;  %2686 = vmatmul.mubr.msk.f32.vlgmr.msra.gmra.mxu1 %vm157_vm1, %v3170_v12  ;;  %v47_v22 = vld [vmem:[%s5387_s1 + $0xb0] sm:$0xff]  ;;  %v29_v23 = vld [vmem:[%s5387_s1 + $0x20] sm:$0xff]  ;;  %v32_v24 = vld [vmem:[%s5387_s1 + $0x38] sm:$0xff] }
   0x9   :  { %2687 = vmatprep.subr.msk.mxu0 %vm161_vm0, %v62_v14  ;;  %2690 = vmatprep.subr.msk.mxu1 %vm161_vm0, %v64_v15  ;;  %v31_v25 = vld [vmem:[%s5387_s1 + $0x30] sm:$0xff]  ;;  %v66_v26 = vld [vmem:[%s5387_s1 + $0x148] sm:$0x1]  ;;  %v65_v27 = vld [vmem:[%s5387_s1 + $0x140] sm:$0x1] }
   0xa   :  { %2688 = vmatpush1.msk.msra.mxu0 %vm161_vm0, %v61_v16  ;;  %2691 = vmatpush1.msk.msra.mxu1 %vm161_vm0, %v63_v17  ;;  %v50_v28 = vld [vmem:[%s5387_s1 + $0xc8] sm:$0xff]  ;;  %v68_v29 = vld [vmem:[%s5387_s1 + $0x158] sm:$0x1]  ;;  %v49_v30 = vld [vmem:[%s5387_s1 + $0xc0] sm:$0xff] }
   0xb   :  { %380 = vmatprep.subr.mxu0 %v46_v18  ;;  %451 = vmatprep.subr.mxu1 %v48_v19  ;;  %v67_v31 = vld [vmem:[%s5387_s1 + $0x150] sm:$0x1] }
   0xc   :  { %381 = vmatpush1.msra.mxu0 %v45_v20  ;;  %416 = vmatprep.mubr.f32.mxu0 %v3090_v13 }
   0xd   :  { %382 = vmatprep.subr.mxu0 %v30_v21  ;;  %452 = vmatpush1.msra.mxu1 %v47_v22 }
   0xe   :  { %383 = vmatpush1.msra.mxu0 %v29_v23  ;;  %453 = vmatprep.subr.mxu1 %v32_v24 }
   0xf   :  { %2689 = vmatmul.mubr.msk.f32.vlgmr.msra.gmra.mxu0 %vm157_vm1, %v3170_v12  ;;  %454 = vmatpush1.msra.mxu1 %v31_v25 }
  0x10   :  { %487 = vmatprep.mubr.f32.mxu1 %v3090_v13  ;;  %2693 = vmatprep.subr.msk.mxu0 %vm161_vm0, %v66_v26 }
  0x11   :  { %11 = vsyncpa [#allocation3], 0  ;;  %2692 = vmatmul.mubr.msk.f32.vlgmr.msra.gmra.mxu1 %vm157_vm1, %v3170_v12  ;;  %2694 = vmatpush1.msk.msra.mxu0 %vm161_vm0, %v65_v27  ;;  %v34_v32 = vld [vmem:[%s5387_s1 + $0x48] sm:$0xff]  ;;  %v52_v33 = vld [vmem:[%s5387_s1 + $0xd8] sm:$0xff]  ;;  %vm1163_vm2 = vcmask 1041409   ;;  %vm2665_vm3 = vcmask 50176  }
  0x12   :  { %522 = vmatprep.subr.mxu0 %v50_v28  ;;  %2696 = vmatprep.subr.msk.mxu1 %vm161_vm0, %v68_v29  ;;  %v33_v34 = vld [vmem:[%s5387_s1 + $0x40] sm:$0xff]  ;;  %v51_v35 = vld [vmem:[%s5387_s1 + $0xd0] sm:$0xff]  ;;  %v36_v36 = vld [vmem:[%s5387_s1 + $0x58] sm:$0xff] }
  0x13   :  { %523 = vmatpush1.msra.mxu0 %v49_v30  ;;  %2697 = vmatpush1.msk.msra.mxu1 %vm161_vm0, %v67_v31  ;;  %v35_v37 = vld [vmem:[%s5387_s1 + $0x50] sm:$0xff]  ;;  %v70_v38 = vld [vmem:[%s5387_s1 + $0x168] sm:$0x1]  ;;  %v69_v39 = vld [vmem:[%s5387_s1 + $0x160] sm:$0x1] }
  0x14   :  { %524 = vmatprep.subr.mxu0 %v34_v32  ;;  %593 = vmatprep.subr.mxu1 %v52_v33  ;;  %v54_v40 = vld [vmem:[%s5387_s1 + $0xe8] sm:$0xff]  ;;  %v72_v41 = vld [vmem:[%s5387_s1 + $0x178] sm:$0x1]  ;;  %v53_v42 = vld [vmem:[%s5387_s1 + $0xe0] sm:$0xff] }
  0x15   :  { %525 = vmatpush1.msra.mxu0 %v33_v34  ;;  %558 = vmatprep.mubr.f32.mxu0 %v3090_v13  ;;  %v71_v43 = vld [vmem:[%s5387_s1 + $0x170] sm:$0x1]  ;;  %v38_v44 = vld [vmem:[%s5387_s1 + $0x68] sm:$0xff]  ;;  %v56_v45 = vld [vmem:[%s5387_s1 + $0xf8] sm:$0xff] }
  0x16   :  { %594 = vmatpush1.msra.mxu1 %v51_v35  ;;  %2695 = vmatmul.mubr.msk.f32.vlgmr.msra.gmra.mxu0 %vm157_vm1, %v3170_v12  ;;  %v37_v46 = vld [vmem:[%s5387_s1 + $0x60] sm:$0xff]  ;;  %v55_v47 = vld [vmem:[%s5387_s1 + $0xf0] sm:$0xff]  ;;  %v40_v48 = vld [vmem:[%s5387_s1 + $0x78] sm:$0xff] }
  0x17   :  { %595 = vmatprep.subr.mxu1 %v36_v36  ;;  %629 = vmatprep.mubr.f32.mxu1 %v3090_v13  ;;  %v39_v49 = vld [vmem:[%s5387_s1 + $0x70] sm:$0xff]  ;;  %v1157_v50 = vld [vmem:[%s5390_s4 + $0x1f8] sm:$0xff]  ;;  %v1155_v58 = vld [vmem:[%s5390_s4 + $0x1e8] sm:$0xff] }
  0x18   :  { %596 = vmatpush1.msra.mxu1 %v35_v37  ;;  %2699 = vmatprep.subr.msk.mxu0 %vm161_vm0, %v70_v38  ;;  %v1015_v51 = vld [vmem:[%s5390_s4 + $0xf8] sm:$0xff]  ;;  %v1156_v54 = vld [vmem:[%s5390_s4 + $0x1f0] sm:$0xff]  ;;  %v1013_v59 = vld [vmem:[%s5390_s4 + $0xe8] sm:$0xff] }
  0x19   :  { %2698 = vmatmul.mubr.msk.f32.vlgmr.msra.gmra.mxu1 %vm157_vm1, %v3170_v12  ;;  %2700 = vmatpush1.msk.msra.mxu0 %vm161_vm0, %v69_v39  ;;  %v1141_v52 = vld [vmem:[%s5390_s4 + $0x178] sm:$0xff]  ;;  %v1014_v55 = vld [vmem:[%s5390_s4 + $0xf0] sm:$0xff]  ;;  %v1139_v60 = vld [vmem:[%s5390_s4 + $0x168] sm:$0xff] }
  0x1a   :  { %664 = vmatprep.subr.mxu0 %v54_v40  ;;  %2702 = vmatprep.subr.msk.mxu1 %vm161_vm0, %v72_v41  ;;  %v999_v53 = vld [vmem:[%s5390_s4 + $0x78] sm:$0xff]  ;;  %v1140_v56 = vld [vmem:[%s5390_s4 + $0x170] sm:$0xff]  ;;  %v997_v61 = vld [vmem:[%s5390_s4 + $0x68] sm:$0xff] }
  0x1b   :  { %665 = vmatpush1.msra.mxu0 %v53_v42  ;;  %2703 = vmatpush1.msk.msra.mxu1 %vm161_vm0, %v71_v43  ;;  %v998_v57 = vld [vmem:[%s5390_s4 + $0x70] sm:$0xff]  ;;  %v1154_v62 = vld [vmem:[%s5390_s4 + $0x1e0] sm:$0xff]  ;;  %v1153_v2 = vld [vmem:[%s5390_s4 + $0x1d8] sm:$0xff] }
  0x1c   :  { %666 = vmatprep.subr.mxu0 %v38_v44  ;;  %735 = vmatprep.subr.mxu1 %v56_v45  ;;  %v1012_v63 = vld [vmem:[%s5390_s4 + $0xe0] sm:$0xff]  ;;  %v1011_v3 = vld [vmem:[%s5390_s4 + $0xd8] sm:$0xff]  ;;  %v1152_v6 = vld [vmem:[%s5390_s4 + $0x1d0] sm:$0xff] }
  0x1d   :  { %667 = vmatpush1.msra.mxu0 %v37_v46  ;;  %700 = vmatprep.mubr.f32.mxu0 %v3090_v13  ;;  %v1138_v0 = vld [vmem:[%s5390_s4 + $0x160] sm:$0xff]  ;;  %v1137_v4 = vld [vmem:[%s5390_s4 + $0x158] sm:$0xff]  ;;  %v1010_v7 = vld [vmem:[%s5390_s4 + $0xd0] sm:$0xff] }
  0x1e   :  { %736 = vmatpush1.msra.mxu1 %v55_v47  ;;  %2701 = vmatmul.mubr.msk.f32.vlgmr.msra.gmra.mxu0 %vm157_vm1, %v3170_v12  ;;  %v996_v1 = vld [vmem:[%s5390_s4 + $0x60] sm:$0xff]  ;;  %v995_v5 = vld [vmem:[%s5390_s4 + $0x58] sm:$0xff]  ;;  %v1136_v8 = vld [vmem:[%s5390_s4 + $0x150] sm:$0xff] }
  0x1f   :  { %737 = vmatprep.subr.mxu1 %v40_v48  ;;  %771 = vmatprep.mubr.f32.mxu1 %v3090_v13  ;;  %v994_v9 = vld [vmem:[%s5390_s4 + $0x50] sm:$0xff]  ;;  %v1151_v10 = vld [vmem:[%s5390_s4 + $0x1c8] sm:$0xff]  ;;  %v1150_v15 = vld [vmem:[%s5390_s4 + $0x1c0] sm:$0xff] }
  0x20   :  { %738 = vmatpush1.msra.mxu1 %v39_v49  ;;  %2722 = vmatprep.subr.mxu0 %v1157_v50  ;;  %v1009_v11 = vld [vmem:[%s5390_s4 + $0xc8] sm:$0xff]  ;;  %v1008_v16 = vld [vmem:[%s5390_s4 + $0xc0] sm:$0xff]  ;;  %v1149_v22 = vld [vmem:[%s5390_s4 + $0x1b8] sm:$0xff] }
  0x21   :  { %2704 = vmatmul.mubr.msk.f32.vlgmr.msra.gmra.mxu1 %vm157_vm1, %v3170_v12  ;;  %2757 = vmatprep.subr.mxu1 %v1015_v51  ;;  %v1135_v12 = vld [vmem:[%s5390_s4 + $0x148] sm:$0xff]  ;;  %v1134_v18 = vld [vmem:[%s5390_s4 + $0x140] sm:$0xff]  ;;  %v1007_v23 = vld [vmem:[%s5390_s4 + $0xb8] sm:$0xff] }
  0x22   :  { %2723 = vmatpush3.msra.mxu0 %v1141_v52  ;;  %2758 = vmatpush3.msra.mxu1 %v999_v53  ;;  %v993_v13 = vld [vmem:[%s5390_s4 + $0x48] sm:$0xff]  ;;  %v992_v19 = vld [vmem:[%s5390_s4 + $0x40] sm:$0xff]  ;;  %v1133_v25 = vld [vmem:[%s5390_s4 + $0x138] sm:$0xff] }
  0x23   :  { %2724 = vmatprep.subr.mxu0 %v1156_v54  ;;  %2759 = vmatprep.subr.mxu1 %v1014_v55  ;;  %v3403_v14 = vld [vmem:[%s5389_s3 + $0x8] sm:$0xff]  ;;  %v991_v26 = vld [vmem:[%s5390_s4 + $0x38] sm:$0xff]  ;;  %v1148_v28 = vld [vmem:[%s5390_s4 + $0x1b0] sm:$0xff] }
  0x24   :  { %2725 = vmatpush3.msra.mxu0 %v1140_v56  ;;  %2760 = vmatpush3.msra.mxu1 %v998_v57  ;;  %v3414_v17 = vld [vmem:[%s5389_s3 + $0x48] sm:$0xff]  ;;  %v1031_v20 = vunpack.c.h.bf16 %v3403_v14  ;;  %v1006_v29 = vld [vmem:[%s5390_s4 + $0xb0] sm:$0xff]  ;;  %v1146_v43 = vld [vmem:[%s5390_s4 + $0x1a0] sm:$0xff] }
  0x25   :  { %2726 = vmatprep.subr.mxu0 %v1155_v58  ;;  %2761 = vmatprep.subr.mxu1 %v1013_v59  ;;  %v1033_v21 = vunpack.c.h.bf16 %v3414_v17  ;;  %v3433_v24 = vld [vmem:[%s5389_s3 + $0x88] sm:$0xff]  ;;  %v1132_v31 = vld [vmem:[%s5390_s4 + $0x130] sm:$0xff]  ;;  %v1004_v44 = vld [vmem:[%s5390_s4 + $0xa0] sm:$0xff] }
  0x26   :  { %2727 = vmatpush3.msra.mxu0 %v1139_v60  ;;  %2762 = vmatpush3.msra.mxu1 %v997_v61  ;;  %v3444_v27 = vld [vmem:[%s5389_s3 + $0x1c8] sm:$0xff]  ;;  %v990_v32 = vld [vmem:[%s5390_s4 + $0x30] sm:$0xff]  ;;  %v1035_v33 = vunpack.c.h.bf16 %v3433_v24  ;;  %v1130_v45 = vld [vmem:[%s5390_s4 + $0x120] sm:$0xff] }
  0x27   :  { %2728 = vmatprep.subr.mxu0 %v1154_v62  ;;  %2763 = vmatprep.subr.mxu1 %v1012_v63  ;;  %v3455_v30 = vld [vmem:[%s5389_s3 + $0x208] sm:$0xff]  ;;  %v1045_v34 = vunpack.c.h.bf16 %v3444_v27  ;;  %v1071_v36 = vadd.f32 %v1033_v21, %v1031_v20  ;;  %v988_v46 = vld [vmem:[%s5390_s4 + $0x20] sm:$0xff]  ;;  %v1145_v47 = vld [vmem:[%s5390_s4 + $0x198] sm:$0xff] }
  0x28   :  { %2729 = vmatpush3.msra.mxu0 %v1138_v0  ;;  %2764 = vmatpush3.msra.mxu1 %v996_v1  ;;  %v1047_v35 = vunpack.c.h.bf16 %v3455_v30  ;;  %v1147_v37 = vld [vmem:[%s5390_s4 + $0x1a8] sm:$0xff]  ;;  %v1003_v48 = vld [vmem:[%s5390_s4 + $0x98] sm:$0xff]  ;;  %v1144_v55 = vld [vmem:[%s5390_s4 + $0x190] sm:$0xff] }
  0x29   :  { %2730 = vmatprep.subr.mxu0 %v1153_v2  ;;  %2765 = vmatprep.subr.mxu1 %v1011_v3  ;;  %v1005_v38 = vld [vmem:[%s5390_s4 + $0xa8] sm:$0xff]  ;;  %v1129_v49 = vld [vmem:[%s5390_s4 + $0x118] sm:$0xff]  ;;  %v1072_v53 = vadd.f32 %v1071_v36, %v1035_v33  ;;  %v1002_v56 = vld [vmem:[%s5390_s4 + $0x90] sm:$0xff] }
  0x2a   :  { %2731 = vmatpush3.msra.mxu0 %v1137_v4  ;;  %2766 = vmatpush3.msra.mxu1 %v995_v5  ;;  %v1131_v39 = vld [vmem:[%s5390_s4 + $0x128] sm:$0xff]  ;;  %v987_v50 = vld [vmem:[%s5390_s4 + $0x18] sm:$0xff]  ;;  %v1097_v54 = vadd.f32 %v1047_v35, %v1045_v34  ;;  %v1128_v57 = vld [vmem:[%s5390_s4 + $0x110] sm:$0xff] }
  0x2b   :  { %2732 = vmatprep.subr.mxu0 %v1152_v6  ;;  %2767 = vmatprep.subr.mxu1 %v1010_v7  ;;  %v3478_v40 = vld [vmem:[%s5389_s3 + $0xc8] sm:$0xff]  ;;  %v986_v58 = vld [vmem:[%s5390_s4 + $0x10] sm:$0xff]  ;;  %v1142_v5 = vld [vmem:[%s5390_s4 + $0x180] sm:$0xff] }
  0x2c   :  { %2733 = vmatpush3.msra.mxu0 %v1136_v8  ;;  %2768 = vmatpush3.msra.mxu1 %v994_v9  ;;  %v3483_v41 = vld [vmem:[%s5389_s3 + $0x248] sm:$0xff]  ;;  %v1037_v51 = vunpack.c.h.bf16 %v3478_v40  ;;  %v1000_v6 = vld [vmem:[%s5390_s4 + $0x80] sm:$0xff]  ;;  %v77_v8 = vlaneseq }
  0x2d   :  { %2734 = vmatprep.subr.mxu0 %v1151_v10  ;;  %2769 = vmatprep.subr.mxu1 %v1009_v11  ;;  %v989_v42 = vld [vmem:[%s5390_s4 + $0x28] sm:$0xff]  ;;  %v1049_v52 = vunpack.c.h.bf16 %v3483_v41  ;;  %v3559_v7 = vld [vmem:[%s5389_s3] sm:$0xff] }
  0x2e   :  { %2735 = vmatpush3.msra.mxu0 %v1135_v12  ;;  %2770 = vmatpush3.msra.mxu1 %v993_v13  ;;  %v3529_v59 = vld [vmem:[%s5389_s3 + $0x108] sm:$0xff]  ;;  %v1073_v3 = vadd.f32 %v1072_v53, %v1037_v51  ;;  %v1126_v9 = vld [vmem:[%s5390_s4 + $0x100] sm:$0xff]  ;;  %v1036_v51 = vunpack.c.l.bf16 %v3478_v40 }
  0x2f   :  { %2736 = vmatprep.subr.mxu0 %v1150_v15  ;;  %2771 = vmatprep.subr.mxu1 %v1008_v16  ;;  %v1143_v60 = vld [vmem:[%s5390_s4 + $0x188] sm:$0xff]  ;;  %v1039_v1 = vunpack.c.h.bf16 %v3529_v59  ;;  %v1098_v4 = vadd.f32 %v1097_v54, %v1049_v52  ;;  %v984_v10 = vld [vmem:[%s5390_s4] sm:$0xff]  ;;  %v1030_v15 = vunpack.c.l.bf16 %v3403_v14  ;;  %v1032_v16 = vunpack.c.l.bf16 %v3414_v17 }
  0x30   :  { %2737 = vmatpush3.msra.mxu0 %v1134_v18  ;;  %2772 = vmatpush3.msra.mxu1 %v992_v19  ;;  %v1001_v61 = vld [vmem:[%s5390_s4 + $0x88] sm:$0xff]  ;;  %v3570_v11 = vld [vmem:[%s5389_s3 + $0x40] sm:$0xff]  ;;  %v889_v14 = vunpack.c.h.bf16 %v3559_v7 }
  0x31   :  { %2738 = vmatprep.subr.mxu0 %v1149_v22  ;;  %2773 = vmatprep.subr.mxu1 %v1007_v23  ;;  %v3540_v62 = vld [vmem:[%s5389_s3 + $0x288] sm:$0xff]  ;;  %v1074_v21 = vadd.f32 %v1073_v3, %v1039_v1  ;;  %v891_v17 = vunpack.c.h.bf16 %v3570_v11  ;;  %v1058_v33 = vadd.f32 %v1032_v16, %v1030_v15  ;;  %v1038_v3 = vunpack.c.l.bf16 %v3529_v59  ;;  %v3694_v59 = vld [vmem:[%s5389_s3 + $0x180] sm:$0x11] }
  0x32   :  { %2739 = vmatpush3.msra.mxu0 %v1133_v25  ;;  %2774 = vmatpush3.msra.mxu1 %v991_v26  ;;  %v1127_v63 = vld [vmem:[%s5390_s4 + $0x108] sm:$0xff]  ;;  %v1051_v2 = vunpack.c.h.bf16 %v3540_v62  ;;  %v1460_v25 = vld [vmem:[%s5390_s4 + $0x2f8] sm:$0xff]  ;;  %v1044_v16 = vunpack.c.l.bf16 %v3444_v27  ;;  %v1050_v27 = vunpack.c.l.bf16 %v3540_v62  ;;  %v901_v62 = vunpack.c.h.bf16 %v3694_v59 }
  0x33   :  { %2740 = vmatprep.subr.mxu0 %v1148_v28  ;;  %2775 = vmatprep.subr.mxu1 %v1006_v29  ;;  %v985_v0 = vld [vmem:[%s5390_s4 + $0x8] sm:$0xff]  ;;  %v1683_v26 = vld [vmem:[%s5390_s4 + $0x3f8] sm:$0xff]  ;;  %v3600_v28 = vshrl.u32 %v77_v8, 7  ;;  %v3605_v29 = vld [vmem:[%s5389_s3 + $0x80] sm:$0xff] }
  0x34   :  { %2741 = vmatpush3.msra.mxu0 %v1132_v31  ;;  %2776 = vmatpush3.msra.mxu1 %v990_v32  ;;  %v3575_v12 = vld [vmem:[%s5389_s3 + $0x148] sm:$0xff]  ;;  %v1099_v22 = vadd.f32 %v1098_v4, %v1051_v2  ;;  %v1034_v32 = vunpack.c.l.bf16 %v3433_v24  ;;  %v3679_v2 = vld [vmem:[%s5389_s3 + $0x240] sm:$0xff] }
  0x35   :  { %2742 = vmatprep.subr.mxu0 %v1147_v37  ;;  %2777 = vmatprep.subr.mxu1 %v1005_v38  ;;  %v3580_v13 = vld [vmem:[%s5389_s3 + $0x2c8] sm:$0xff]  ;;  %v1041_v19 = vunpack.c.h.bf16 %v3575_v12  ;;  %5410 = vst [vmem:[#allocation5_spill] sm:$0xff] %v3600_v28  ;;  %v5398_v24 = vsub.s32 2, %v3600_v28  ;;  %v907_v8 = vunpack.c.h.bf16 %v3679_v2 }
  0x36   :  { %2743 = vmatpush3.msra.mxu0 %v1131_v39  ;;  %2778 = vmatpush3.msra.mxu1 %v989_v42  ;;  %v3587_v18 = vld [vmem:[%s5389_s3 + $0x188] sm:$0x11]  ;;  %v1053_v20 = vunpack.c.h.bf16 %v3580_v13  ;;  %v893_v42 = vunpack.c.h.bf16 %v3605_v29  ;;  %v1059_v52 = vadd.f32 %v1058_v33, %v1034_v32 }
  0x37   :  { %2744 = vmatprep.subr.mxu0 %v1146_v43  ;;  %2779 = vmatprep.subr.mxu1 %v1004_v44  ;;  %v1043_v23 = vunpack.c.h.bf16 %v3587_v18  ;;  %v3610_v31 = vld [vmem:[%s5389_s3 + $0x308] sm:$0xff]  ;;  %v1075_v36 = vadd.f32 %v1074_v21, %v1041_v19  ;;  %v929_v43 = vadd.f32 %v891_v17, %v889_v14  ;;  %v5400_v44 = vsub.s32 0, %v3600_v28 }
  0x38   :  { %2745 = vmatpush3.msra.mxu0 %v1130_v45  ;;  %2780 = vmatpush3.msra.mxu1 %v988_v46  ;;  %v3616_v34 = vld [vmem:[%s5389_s3 + $0x348] sm:$0x11]  ;;  %v1055_v35 = vunpack.c.h.bf16 %v3610_v31  ;;  %v1100_v37 = vadd.f32 %v1099_v22, %v1053_v20  ;;  %v3627_v45 = vld [vmem:[%s5389_s3 + $0xc0] sm:$0xff]  ;;  %v1060_v4 = vadd.f32 %v1059_v52, %v1036_v51  ;;  %v1046_v19 = vunpack.c.l.bf16 %v3455_v30 }
  0x39   :  { %2746 = vmatprep.subr.mxu0 %v1145_v47  ;;  %2781 = vmatprep.subr.mxu1 %v1003_v48  ;;  %v1057_v38 = vunpack.c.h.bf16 %v3616_v34  ;;  %v1076_v39 = vsel %vm161_vm0, %v1043_v23, 0.0  ;;  %v3632_v46 = vld [vmem:[%s5388_s2] sm:$0xff]  ;;  %v5399_v47 = vsub.s32 1, %v3600_v28  ;;  %v5397_v48 = vsub.s32 3, %v3600_v28 }
  0x3a   :  { %2747 = vmatpush3.msra.mxu0 %v1129_v49  ;;  %2782 = vmatpush3.msra.mxu1 %v987_v50  ;;  %v3639_v49 = vld [vmem:[%s5389_s3 + $0x1c0] sm:$0xff]  ;;  %v1077_v53 = vadd.f32 %v1076_v39, %v1075_v36  ;;  %v1101_v54 = vadd.f32 %v1100_v37, %v1055_v35  ;;  %v3659_v40 = vrot.slane %v3632_v46, %v5398_v24  ;;  %v1040_v21 = vunpack.c.l.bf16 %v3575_v12 }
  0x3b   :  { %2748 = vmatprep.subr.mxu0 %v1144_v55  ;;  %2783 = vmatprep.subr.mxu1 %v1002_v56  ;;  %v3644_v50 = vld [vmem:[%s5389_s3 + $0x200] sm:$0xff]  ;;  %v903_v55 = vunpack.c.h.bf16 %v3639_v49  ;;  %v3674_v1 = vrot.slane %v3632_v46, %v5397_v48  ;;  %v1042_v22 = vunpack.c.l.bf16 %v3587_v18  ;;  %v1048_v23 = vunpack.c.l.bf16 %v3483_v41 }
  0x3c   :  { %2749 = vmatpush3.msra.mxu0 %v1128_v57  ;;  %2784 = vmatpush3.msra.mxu1 %v986_v58  ;;  %v905_v56 = vunpack.c.h.bf16 %v3644_v50  ;;  %v1102_v57 = vsel %vm161_vm0, %v1057_v38, 0.0  ;;  %v895_v58 = vunpack.c.h.bf16 %v3627_v45  ;;  %5412 = vst [vmem:[#allocation7_spill] sm:$0xff] %v3659_v40  ;;  %v3689_v20 = vld [vmem:[%s5389_s3 + $0x140] sm:$0xff]  ;;  %v1052_v14 = vunpack.c.l.bf16 %v3580_v13 }
  0x3d   :  { %2750 = vmatprep.subr.mxu0 %v1143_v60  ;;  %2785 = vmatprep.subr.mxu1 %v1001_v61  ;;  %v930_v60 = vadd.f32 %v929_v43, %v893_v42  ;;  %v3654_v61 = vrot.slane %v3632_v46, %v5400_v44  ;;  %5414 = vst [vmem:[#allocation9_spill] sm:$0xff] %v3674_v1  ;;  %v3703_v30 = vld [vmem:[%s5389_s3 + $0x280] sm:$0xff]  ;;  %v1054_v17 = vunpack.c.l.bf16 %v3610_v31  ;;  %v899_v41 = vunpack.c.h.bf16 %v3689_v20  ;;  %v3868_v31 = vld [vmem:[%s5389_s3 + $0x110] sm:$0xff] }
  0x3e   :  { %2751 = vmatpush3.msra.mxu0 %v1127_v63  ;;  %2786 = vmatpush3.msra.mxu1 %v985_v0  ;;  %v3664_v63 = vld [vmem:[%s5389_s3 + $0x100] sm:$0xff]  ;;  %v3669_v0 = vrot.slane %v3632_v46, %v5399_v47  ;;  %v909_v18 = vunpack.c.h.bf16 %v3703_v30  ;;  %v1084_v36 = vadd.f32 %v1046_v19, %v1044_v16  ;;  %v5396_v37 = vsub.s32 4, %v3600_v28 }
  0x3f   :  { %2752 = vmatprep.subr.mxu0 %v1142_v5  ;;  %2787 = vmatprep.subr.mxu1 %v1000_v6  ;;  %5411 = vst [vmem:[#allocation6_spill] sm:$0xff] %v3654_v61  ;;  %v1078_v5 = vrot.slane %v1077_v53, 4  ;;  %v1103_v6 = vadd.f32 %v1102_v57, %v1101_v54  ;;  %v931_v15 = vadd.f32 %v930_v60, %v895_v58  ;;  %v1063_v38 = vsel %vm161_vm0, %v1042_v22, 0.0  ;;  %v3720_v51 = vld [vmem:[%s5389_s3 + $0x2c0] sm:$0xff] }
  0x40   :  { %2753 = vmatpush3.msra.mxu0 %v1126_v9  ;;  %2788 = vmatpush3.msra.mxu1 %v984_v10  ;;  %5413 = vst [vmem:[#allocation8_spill] sm:$0xff] %v3669_v0  ;;  %v955_v9 = vadd.f32 %v905_v56, %v903_v55  ;;  %v897_v10 = vunpack.c.h.bf16 %v3664_v63  ;;  %v888_v39 = vunpack.c.l.bf16 %v3559_v7  ;;  %v5395_v42 = vsub.s32 5, %v3600_v28 }
  0x41   :  { %2792 = vmatprep.subr.mxu0 %v1460_v25  ;;  %2827 = vmatprep.subr.mxu1 %v1683_v26  ;;  %v1056_v25 = vunpack.c.l.bf16 %v3616_v34  ;;  %v1061_v26 = vadd.f32 %v1060_v4, %v1038_v3  ;;  %v1079_v32 = vadd.f32 %v1078_v5, %v1077_v53  ;;  %v1104_v12 = vrot.slane %v1103_v6, 4  ;;  %v3731_v3 = vld [vmem:[%s5389_s3 + $0x300] sm:$0xff] }
  0x42   :  { %v956_v33 = vadd.f32 %v955_v9, %v907_v8  ;;  %v932_v35 = vadd.f32 %v931_v15, %v897_v10  ;;  %v890_v34 = vunpack.c.l.bf16 %v3570_v11  ;;  %v5394_v43 = vsub.s32 6, %v3600_v28 }
  0x43   :  { %v1062_v52 = vadd.f32 %v1061_v26, %v1040_v21  ;;  %v3723_v53 = vsel %vm161_vm0, %v1056_v25, 0.0  ;;  %v1080_v54 = vrot.slane %v1079_v32, 2  ;;  %v1105_v55 = vadd.f32 %v1104_v12, %v1103_v6  ;;  %v3773_v25 = vld [vmem:[%s5389_s3 + $0x1d0] sm:$0xff] }
  0x44   :  { %v911_v56 = vunpack.c.h.bf16 %v3720_v51  ;;  %v957_v7 = vadd.f32 %v956_v33, %v909_v18  ;;  %v5393_v11 = vsub.s32 7, %v3600_v28  ;;  %v933_v57 = vadd.f32 %v932_v35, %v899_v41  ;;  %v3778_v26 = vld [vmem:[%s5389_s3 + $0x210] sm:$0xff] }
  0x45   :  { %v934_v58 = vsel %vm161_vm0, %v901_v62, 0.0  ;;  %v1085_v60 = vadd.f32 %v1084_v36, %v1048_v23  ;;  %v892_v4 = vunpack.c.l.bf16 %v3605_v29  ;;  %v902_v5 = vunpack.c.l.bf16 %v3639_v49  ;;  %v3754_v29 = vld [vmem:[%s5389_s3 + $0x340] sm:$0x11]  ;;  %v3768_v23 = vld [vmem:[%s5389_s3 + $0x50] sm:$0xff] }
  0x46   :  { %v904_v6 = vunpack.c.l.bf16 %v3644_v50  ;;  %v916_v8 = vadd.f32 %v890_v34, %v888_v39  ;;  %v3739_v9 = vrot.slane %v3632_v46, %v5396_v37  ;;  %v3744_v10 = vrot.slane %v3632_v46, %v5395_v42  ;;  %v3760_v50 = vld [vmem:[%s5389_s3 + $0x10] sm:$0xff] }
  0x47   :  { %v3749_v15 = vrot.slane %v3632_v46, %v5394_v43  ;;  %v913_v49 = vunpack.c.h.bf16 %v3731_v3  ;;  %v3762_v16 = vadd.f32 %v1080_v54, %v1079_v32  ;;  %v1106_v19 = vrot.slane %v1105_v55, 2  ;;  %v3792_v39 = vld [vmem:[%s5389_s3 + $0x90] sm:$0xff] }
  0x48   :  { %5415 = vst [vmem:[#allocation10_spill] sm:$0xff] %v3739_v9  ;;  %5416 = vst [vmem:[#allocation11_spill] sm:$0xff] %v3744_v10  ;;  %v915_v21 = vunpack.c.h.bf16 %v3754_v29  ;;  %v958_v22 = vadd.f32 %v957_v7, %v911_v56  ;;  %v3783_v32 = vrot.slane %v3632_v46, %v5393_v11  ;;  %v935_v12 = vadd.f32 %v934_v58, %v933_v57  ;;  %v3797_v46 = vld [vmem:[%s5389_s3 + $0x250] sm:$0xff]  ;;  %v3810_v7 = vld [vmem:[%s5389_s3 + $0x18] sm:$0xff] }
  0x49   :  { %5417 = vst [vmem:[#allocation12_spill] sm:$0xff] %v3749_v15  ;;  %v3785_v18 = vadd.f32 %v1063_v38, %v1062_v52  ;;  %v1086_v33 = vadd.f32 %v1085_v60, %v1050_v27  ;;  %v894_v41 = vunpack.c.l.bf16 %v3627_v45  ;;  %v906_v62 = vunpack.c.l.bf16 %v3679_v2  ;;  %v3815_v57 = vld [vmem:[%s5389_s3 + $0x58] sm:$0xff] }
  0x4a   :  { %5418 = vst [vmem:[#allocation13_spill] sm:$0xff] %v3783_v32  ;;  %v917_v35 = vadd.f32 %v916_v8, %v892_v4  ;;  %v942_v36 = vadd.f32 %v904_v6, %v902_v5  ;;  %v1334_v38 = vunpack.c.h.bf16 %v3760_v50  ;;  %v1336_v27 = vunpack.c.h.bf16 %v3768_v23  ;;  %v3824_v5 = vld [vmem:[%s5389_s3 + $0x1d8] sm:$0xff] }
  0x4b   :  { %v1348_v45 = vunpack.c.h.bf16 %v3773_v25  ;;  %v1350_v2 = vunpack.c.h.bf16 %v3778_v26  ;;  %v3804_v52 = vadd.f32 %v1106_v19, %v1105_v55  ;;  %v959_v54 = vadd.f32 %v958_v22, %v913_v49  ;;  %v3829_v6 = vld [vmem:[%s5389_s3 + $0x218] sm:$0xff] }
  0x4c   :  { %v960_v56 = vsel %vm161_vm0, %v915_v21, 0.0  ;;  %v936_v58 = vrot.slane %v935_v12, 4  ;;  %v1087_v60 = vadd.f32 %v1086_v33, %v1052_v14  ;;  %v896_v55 = vunpack.c.l.bf16 %v3664_v63  ;;  %v3836_v63 = vld [vmem:[%s5389_s3 + $0xd0] sm:$0xff]  ;;  %v3957_v10 = vld [vmem:[%s5389_s3 + $0x358] sm:$0x11] }
  0x4d   :  { %v908_v4 = vunpack.c.l.bf16 %v3703_v30  ;;  %v918_v8 = vadd.f32 %v917_v35, %v894_v41  ;;  %v943_v49 = vadd.f32 %v942_v36, %v906_v62  ;;  %v1338_v19 = vunpack.c.h.bf16 %v3792_v39  ;;  %v3841_v30 = vld [vmem:[%s5389_s3 + $0x290] sm:$0xff]  ;;  %v3849_v35 = vld [vmem:[%s5389_s3 + $0x98] sm:$0xff]  ;;  %5421 = vst [vmem:[#allocation16_spill] sm:$0xff] %v3957_v10 }
  0x4e   :  { %v1352_v13 = vunpack.c.h.bf16 %v3797_v46  ;;  %v1374_v14 = vadd.f32 %v1336_v27, %v1334_v38  ;;  %v1400_v21 = vadd.f32 %v1350_v2, %v1348_v45  ;;  %v1557_v22 = vunpack.c.h.bf16 %v3810_v7 }
  0x4f   :  { %v1559_v33 = vunpack.c.h.bf16 %v3815_v57  ;;  %v961_v41 = vadd.f32 %v960_v56, %v959_v54  ;;  %v1065_v62 = vrot.slane %v3785_v18, 4  ;;  %v1571_v36 = vunpack.c.h.bf16 %v3824_v5  ;;  %v3861_v54 = vld [vmem:[%s5389_s3 + $0x258] sm:$0xff] }
  0x50   :  { %v1573_v11 = vunpack.c.h.bf16 %v3829_v6  ;;  %v1088_v38 = vadd.f32 %v1087_v60, %v1054_v17  ;;  %v898_v27 = vunpack.c.l.bf16 %v3689_v20  ;;  %v900_v45 = vunpack.c.l.bf16 %v3694_v59  ;;  %v3873_v20 = vld [vmem:[%s5389_s3 + $0x2d0] sm:$0xff] }
  0x51   :  { %v910_v2 = vunpack.c.l.bf16 %v3720_v51  ;;  %v919_v56 = vadd.f32 %v918_v8, %v896_v55  ;;  %v944_v43 = vadd.f32 %v943_v49, %v908_v4  ;;  %v1340_v42 = vunpack.c.h.bf16 %v3836_v63  ;;  %v3881_v8 = vld [vmem:[%s5389_s3 + $0xd8] sm:$0xff] }
  0x52   :  { %v1354_v37 = vunpack.c.h.bf16 %v3841_v30  ;;  %v1375_v59 = vadd.f32 %v1374_v14, %v1338_v19  ;;  %v1401_v17 = vadd.f32 %v1400_v21, %v1352_v13  ;;  %v1561_v51 = vunpack.c.h.bf16 %v3849_v35  ;;  %v3896_v21 = vld [vmem:[%s5389_s3 + $0x150] sm:$0xff] }
  0x53   :  { %v1597_v60 = vadd.f32 %v1559_v33, %v1557_v22  ;;  %v3876_v55 = vadd.f32 %v936_v58, %v935_v12  ;;  %v962_v4 = vrot.slane %v961_v41, 4  ;;  %v1575_v49 = vunpack.c.h.bf16 %v3861_v54  ;;  %v3891_v12 = vld [vmem:[%s5389_s3 + $0x298] sm:$0xff] }
  0x54   :  { %v1623_v48 = vadd.f32 %v1573_v11, %v1571_v36  ;;  %v1090_v24 = vadd.f32 %v3723_v53, %v1088_v38  ;;  %v912_v47 = vunpack.c.l.bf16 %v3731_v3  ;;  %v914_v19 = vunpack.c.l.bf16 %v3754_v29  ;;  %v3901_v53 = vld [vmem:[%s5389_s3 + $0x190] sm:$0x11] }
  0x55   :  { %v921_v13 = vsel %vm161_vm0, %v900_v45, 0.0  ;;  %v920_v58 = vadd.f32 %v919_v56, %v898_v27  ;;  %v945_v14 = vadd.f32 %v944_v43, %v910_v2  ;;  %v1342_v11 = vunpack.c.h.bf16 %v3868_v31  ;;  %v3908_v29 = vld [vmem:[%s5389_s3 + $0x310] sm:$0xff]  ;;  %v3920_v2 = vld [vmem:[%s5389_s3 + $0x118] sm:$0xff] }
  0x56   :  { %v1356_v3 = vunpack.c.h.bf16 %v3873_v20  ;;  %v3913_v43 = vld [vmem:[%s5389_s3 + $0x350] sm:$0x11]  ;;  %v1376_v22 = vadd.f32 %v1375_v59, %v1340_v42  ;;  %v1402_v33 = vadd.f32 %v1401_v17, %v1354_v37  ;;  %v1563_v36 = vunpack.c.h.bf16 %v3881_v8 }
  0x57   :  { %v1598_v38 = vadd.f32 %v1597_v60, %v1561_v51  ;;  %v963_v27 = vadd.f32 %v962_v4, %v961_v41  ;;  %v1066_v45 = vadd.f32 %v1065_v62, %v3785_v18  ;;  %v1577_v56 = vunpack.c.h.bf16 %v3891_v12  ;;  %v3929_v41 = vld [vmem:[%s5389_s3 + $0x2d8] sm:$0xff] }
  0x58   :  { %v1624_v44 = vadd.f32 %v1623_v48, %v1575_v49  ;;  %v1091_v34 = vrot.slane %v1090_v24, 4  ;;  %v947_v15 = vsel %vm161_vm0, %v914_v19, 0.0  ;;  %v1344_v42 = vunpack.c.h.bf16 %v3896_v21  ;;  %v3936_v60 = vld [vmem:[%s5389_s3 + $0x158] sm:$0xff] }
  0x59   :  { %v1346_v37 = vunpack.c.h.bf16 %v3901_v53  ;;  %v922_v18 = vadd.f32 %v921_v13, %v920_v58  ;;  %v946_v62 = vadd.f32 %v945_v14, %v912_v47  ;;  %v1358_v59 = vunpack.c.h.bf16 %v3908_v29  ;;  %5419 = vst [vmem:[#allocation14_spill] sm:$0xff] %v3936_v60  ;;  %v3944_v47 = vld [vmem:[%s5389_s3 + $0x198] sm:$0x11] }
  0x5a   :  { %v1360_v17 = vunpack.c.h.bf16 %v3913_v43  ;;  %v1377_v51 = vadd.f32 %v1376_v22, %v1342_v11  ;;  %v1403_v48 = vadd.f32 %v1402_v33, %v1356_v3  ;;  %v1565_v4 = vunpack.c.h.bf16 %v3920_v2  ;;  %v3951_v33 = vld [vmem:[%s5389_s3 + $0x318] sm:$0xff] }
  0x5b   :  { %v1599_v49 = vadd.f32 %v1598_v38, %v1563_v36  ;;  %v1108_v19 = vrot.slane %v3804_v52, 1  ;;  %v938_v9 = vrot.slane %v3876_v55, 2  ;;  %v1579_v13 = vunpack.c.h.bf16 %v3929_v41  ;;  %5420 = vst [vmem:[#allocation15_spill] sm:$0xff] %v3951_v33 }
  0x5c   :  { %v1625_v58 = vadd.f32 %v1624_v44, %v1577_v56  ;;  %v964_v14 = vrot.slane %v963_v27, 2  ;;  %v1067_v11 = vrot.slane %v1066_v45, 2  ;;  %v1092_v3 = vadd.f32 %v1091_v34, %v1090_v24 }
  0x5d   :  { %v1379_v22 = vsel %vm161_vm0, %v1346_v37, 0.0  ;;  %v923_v36 = vrot.slane %v922_v18, 4  ;;  %v948_v38 = vadd.f32 %v947_v15, %v946_v62  ;;  %v1405_v32 = vsel %vm161_vm0, %v1360_v17, 0.0 }
  0x5e   :  { %v1567_v44 = vunpack.c.h.bf16 %v3936_v60  ;;  %v1378_v56 = vadd.f32 %v1377_v51, %v1344_v42  ;;  %v1404_v24 = vadd.f32 %v1403_v48, %v1358_v59  ;;  %v1569_v34 = vunpack.c.h.bf16 %v3944_v47 }
  0x5f   :  { %v1600_v37 = vadd.f32 %v1599_v49, %v1565_v4  ;;  %v1581_v1 = vunpack.c.h.bf16 %v3951_v33  ;;  %v1626_v0 = vadd.f32 %v1625_v58, %v1579_v13  ;;  %v1333_v40 = vunpack.c.l.bf16 %v3760_v50 }
  0x60   :  { %v1335_v15 = vunpack.c.l.bf16 %v3768_v23  ;;  %v939_v62 = vadd.f32 %v938_v9, %v3876_v55  ;;  %v1583_v17 = vunpack.c.h.bf16 %v3957_v10  ;;  %v1347_v61 = vunpack.c.l.bf16 %v3773_v25 }
  0x61   :  { %v1349_v60 = vunpack.c.l.bf16 %v3778_v26  ;;  %v965_v42 = vadd.f32 %v964_v14, %v963_v27  ;;  %v1068_v59 = vadd.f32 %v1067_v11, %v1066_v45  ;;  %v1093_v51 = vrot.slane %v1092_v3, 2 }
  0x62   :  { %v949_v48 = vrot.slane %v948_v38, 4  ;;  %v924_v4 = vadd.f32 %v923_v36, %v922_v18  ;;  %v1380_v49 = vadd.f32 %v1379_v22, %v1378_v56  ;;  %v1406_v33 = vadd.f32 %v1405_v32, %v1404_v24 }
  0x63   :  { %v1601_v13 = vadd.f32 %v1600_v37, %v1567_v44  ;;  %v1602_v50 = vsel %vm161_vm0, %v1569_v34, 0.0  ;;  %v1627_v58 = vadd.f32 %v1626_v0, %v1581_v1  ;;  %v1337_v23 = vunpack.c.l.bf16 %v3792_v39 }
  0x64   :  { %v1361_v9 = vadd.f32 %v1335_v15, %v1333_v40  ;;  %v940_v55 = vrot.slane %v939_v62, 1  ;;  %v1628_v10 = vsel %vm161_vm0, %v1583_v17, 0.0  ;;  %v1351_v25 = vunpack.c.l.bf16 %v3797_v46 }
  0x65   :  { %v1387_v26 = vadd.f32 %v1349_v60, %v1347_v61  ;;  %v966_v27 = vrot.slane %v965_v42, 1  ;;  %v1069_v45 = vrot.slane %v1068_v59, 1  ;;  %v1094_v14 = vadd.f32 %v1093_v51, %v1092_v3 }
  0x66   :  { %v950_v11 = vadd.f32 %v949_v48, %v948_v38  ;;  %v925_v18 = vrot.slane %v924_v4, 2  ;;  %v1381_v22 = vrot.slane %v1380_v49, 4  ;;  %v1407_v32 = vrot.slane %v1406_v33, 4 }
  0x67   :  { %v1603_v36 = vadd.f32 %v1602_v50, %v1601_v13  ;;  %v5422_v0 = vrot.slane %v3762_v16, 1  ;;  %v1629_v39 = vadd.f32 %v1628_v10, %v1627_v58  ;;  %v1339_v40 = vunpack.c.l.bf16 %v3836_v63 }
  0x68   :  { %v1362_v44 = vadd.f32 %v1361_v9, %v1337_v23  ;;  %v1109_v56 = vadd.f32 %v1108_v19, %v3804_v52  ;;  %v941_v46 = vadd.f32 %v940_v55, %v939_v62  ;;  %v1353_v61 = vunpack.c.l.bf16 %v3841_v30 }
  0x69   :  { %v1083_v1 = vadd.f32 %v5422_v0, %v3762_v16  ;;  %v1388_v60 = vadd.f32 %v1387_v26, %v1351_v25  ;;  %v967_v3 = vadd.f32 %v966_v27, %v965_v42  ;;  %v1070_v38 = vadd.f32 %v1069_v45, %v1068_v59 }
  0x6a   :  { %v1095_v24 = vrot.slane %v1094_v14, 1  ;;  %v951_v34 = vrot.slane %v950_v11, 2  ;;  %v926_v37 = vadd.f32 %v925_v18, %v924_v4  ;;  %v1382_v15 = vadd.f32 %v1381_v22, %v1380_v49 }
  0x6b   :  { %v1408_v17 = vadd.f32 %v1407_v32, %v1406_v33  ;;  %v1604_v51 = vrot.slane %v1603_v36, 4  ;;  %v3978_v48 = vmul.f32 0.020408163, %v1083_v1  ;;  %v1630_v10 = vrot.slane %v1629_v39, 4 }
  0x6c   :  { %v1341_v16 = vunpack.c.l.bf16 %v3868_v31  ;;  %v1363_v63 = vadd.f32 %v1362_v44, %v1339_v40  ;;  %v3981_v13 = vmul.f32 0.020408163, %v1109_v56  ;;  %v3983_v52 = vmul.f32 0.020408163, %v941_v46 }
  0x6d   :  { %5423 = vst [vmem:[#allocation17_spill] sm:$0xff] %v3978_v48  ;;  %v1355_v30 = vunpack.c.l.bf16 %v3873_v20  ;;  %v1389_v19 = vadd.f32 %v1388_v60, %v1353_v61  ;;  %v3986_v62 = vmul.f32 0.020408163, %v967_v3  ;;  %v1096_v42 = vadd.f32 %v1095_v24, %v1094_v14  ;;  %v3995_v20 = vld [vmem:[%s5388_s2 + $0x8] sm:$0xff]  ;;  %s3091_s2 = smov [#allocation2]  }
  0x6e   :  { %5424 = vst [vmem:[#allocation18_spill] sm:$0xff] %v3981_v13  ;;  %5425 = vst [vmem:[#allocation19_spill] sm:$0xff] %v3983_v52  ;;  %v3988_v59 = vmul.f32 0.020408163, %v1070_v38  ;;  %v952_v33 = vadd.f32 %v951_v34, %v950_v11  ;;  %v927_v4 = vrot.slane %v926_v37, 1  ;;  %v1383_v49 = vrot.slane %v1382_v15, 2 }
  0x6f   :  { %v1409_v50 = vrot.slane %v1408_v17, 2  ;;  %v1605_v58 = vadd.f32 %v1604_v51, %v1603_v36  ;;  %v1631_v23 = vadd.f32 %v1630_v10, %v1629_v39  ;;  %v1343_v31 = vunpack.c.l.bf16 %v3896_v21  ;;  %5427 = vst [vmem:[#allocation21_spill] sm:$0xff] %v3995_v20  ;;  %v4022_v34 = vld [vmem:[%s5389_s3 + $0x20] sm:$0xff]  ;;  %s2673_s8 = sshll.u32 %s3091_s2, 4  ;;  %s2674_s8 = int_to_ptr.vmem [resolvable:$true] %s2673_s8 }
  0x70   :  { %5426 = vst [vmem:[#allocation20_spill] sm:$0xff] %v3988_v59  ;;  %v1345_v9 = vunpack.c.l.bf16 %v3901_v53  ;;  %v1364_v55 = vadd.f32 %v1363_v63, %v1341_v16  ;;  %v1357_v25 = vunpack.c.l.bf16 %v3908_v29  ;;  %v1390_v26 = vadd.f32 %v1389_v19, %v1355_v30  ;;  %s3068_s9 = scalar_lea.vmem %s2674_s8, 32  ;;  %p3073_p1 = scmp.lt.s32.totalorder %s2674_s8, %s2674_s8 }
  0x71   :  { %v1556_v27 = vunpack.c.l.bf16 %v3810_v7  ;;  %v1558_v45 = vunpack.c.l.bf16 %v3815_v57  ;;  %v4000_v14 = vmul.f32 0.020408163, %v1096_v42  ;;  %v1359_v11 = vunpack.c.l.bf16 %v3913_v43  ;;  %p3069_p0 = scmp.ne.s32.totalorder %s2674_s8, %s3068_s9  ;;  %p3074_p2 = scmp.lt.s32.totalorder %s3068_s9, %s3068_s9 }
  0x72   :  { %v1570_v21 = vunpack.c.l.bf16 %v3824_v5  ;;  %v1572_v53 = vunpack.c.l.bf16 %v3829_v6  ;;  %v953_v18 = vrot.slane %v952_v33, 1  ;;  %v1384_v22 = vadd.f32 %v1383_v49, %v1382_v15  ;;  %v4051_v49 = vld [vmem:[%s5389_s3 + $0x220] sm:$0xff] }
  0x73   :  { %v1410_v32 = vadd.f32 %v1409_v50, %v1408_v17  ;;  %v1606_v36 = vrot.slane %v1605_v58, 2  ;;  %v928_v0 = vadd.f32 %v927_v4, %v926_v37  ;;  %v5428_v29 = vsub.s32 0, %v3600_v28  ;;  %v4046_v4 = vld [vmem:[%s5389_s3 + $0x1e0] sm:$0xff]  ;;  %p3075_p3 = por %p3074_p2, %p3073_p1 }
  0x74   :  { %v1632_v7 = vrot.slane %v1631_v23, 2  ;;  %v1365_v57 = vadd.f32 %v1364_v55, %v1343_v31  ;;  %v1366_v39 = vsel %vm161_vm0, %v1345_v9, 0.0  ;;  %v1391_v40 = vadd.f32 %v1390_v26, %v1357_v25  ;;  %v4060_v9 = vld [vmem:[%s5389_s3 + $0xa0] sm:$0xff] }
  0x75   :  { %v4008_v1 = vrot.slane %v3995_v20, %v5428_v29  ;;  %v1560_v43 = vunpack.c.l.bf16 %v3849_v35  ;;  %v1584_v5 = vadd.f32 %v1558_v45, %v1556_v27  ;;  %v5430_v6 = vsub.s32 1, %v3600_v28  ;;  %v4027_v35 = vld [vmem:[%s5389_s3 + $0x60] sm:$0xff]  ;;  %p3076_p4 = pnand %p3075_p3, %p3069_p0 }
  0x76   :  { %v1392_v56 = vsel %vm161_vm0, %v1359_v11, 0.0  ;;  %v1574_v46 = vunpack.c.l.bf16 %v3861_v54  ;;  %v1610_v61 = vadd.f32 %v1572_v53, %v1570_v21  ;;  %v954_v60 = vadd.f32 %v953_v18, %v952_v33 }
  0x77   :  { %5429 = vst [vmem:[#allocation22_spill] sm:$0xff] %v4008_v1  ;;  %v4015_v44 = vrot.slane %v3995_v20, %v5430_v6  ;;  %v1385_v3 = vrot.slane %v1384_v22, 1  ;;  %v1411_v38 = vrot.slane %v1410_v32, 1  ;;  %v1607_v24 = vadd.f32 %v1606_v36, %v1605_v58  ;;  %v5441_v6 = vld [vmem:[#allocation15_spill] sm:$0xff] }
  0x78   :  { %v5432_v37 = vsub.s32 2, %v3600_v28  ;;  %v5434_v54 = vsub.s32 3, %v3600_v28  ;;  %v1633_v51 = vadd.f32 %v1632_v7, %v1631_v23  ;;  %v1367_v10 = vadd.f32 %v1366_v39, %v1365_v57  ;;  %v5439_v7 = vld [vmem:[#allocation16_spill] sm:$0xff] }
  0x79   :  { %5431 = vst [vmem:[#allocation23_spill] sm:$0xff] %v4015_v44  ;;  %v4039_v16 = vmul.f32 0.020408163, %v928_v0  ;;  %v1393_v63 = vadd.f32 %v1392_v56, %v1391_v40  ;;  %v1562_v30 = vunpack.c.l.bf16 %v3881_v8  ;;  %v1585_v19 = vadd.f32 %v1584_v5, %v1560_v43  ;;  %v5440_v43 = vld [vmem:[#allocation14_spill] sm:$0xff] }
  0x7a   :  { %v4032_v15 = vrot.slane %v3995_v20, %v5432_v37  ;;  %v4037_v17 = vrot.slane %v3995_v20, %v5434_v54  ;;  %v1576_v42 = vunpack.c.l.bf16 %v3891_v12  ;;  %v1611_v33 = vadd.f32 %v1610_v61, %v1574_v46  ;;  %v4088_v46 = vld [vmem:[%s5389_s3 + $0x28] sm:$0xff] }
  0x7b   :  { %5436 = vst [vmem:[#allocation26_spill] sm:$0xff] %v4039_v16  ;;  %v1780_v50 = vunpack.c.h.bf16 %v4022_v34  ;;  %v1782_v58 = vunpack.c.h.bf16 %v4027_v35  ;;  %v4055_v23 = vmul.f32 0.020408163, %v954_v60  ;;  %v1386_v8 = vadd.f32 %v1385_v3, %v1384_v22  ;;  %v4093_v61 = vld [vmem:[%s5389_s3 + $0x68] sm:$0xff] }
  0x7c   :  { %5433 = vst [vmem:[#allocation24_spill] sm:$0xff] %v4032_v15  ;;  %5435 = vst [vmem:[#allocation25_spill] sm:$0xff] %v4037_v17  ;;  %v1412_v31 = vadd.f32 %v1411_v38, %v1410_v32  ;;  %v1608_v12 = vrot.slane %v1607_v24, 1  ;;  %v1634_v55 = vrot.slane %v1633_v51, 1  ;;  %v1368_v25 = vrot.slane %v1367_v10, 4  ;;  %v4070_v32 = vld [vmem:[%s5389_s3 + $0x260] sm:$0xff] }
  0x7d   :  { %v1564_v26 = vunpack.c.l.bf16 %v3920_v2  ;;  %v1568_v27 = vunpack.c.l.bf16 %v3944_v47  ;;  %v1394_v45 = vrot.slane %v1393_v63, 4  ;;  %v1586_v11 = vadd.f32 %v1585_v19, %v1562_v30  ;;  %v4100_v38 = vld [vmem:[%s5389_s3 + $0x120] sm:$0xff] }
  0x7e   :  { %v1794_v21 = vunpack.c.h.bf16 %v4046_v4  ;;  %v1796_v53 = vunpack.c.h.bf16 %v4051_v49  ;;  %v1578_v18 = vunpack.c.l.bf16 %v3929_v41  ;;  %v1612_v22 = vadd.f32 %v1611_v33, %v1576_v42  ;;  %v4081_v41 = vld [vmem:[%s5389_s3 + $0xe0] sm:$0xff] }
  0x7f   :  { %v1784_v36 = vunpack.c.h.bf16 %v4060_v9  ;;  %v1820_v0 = vadd.f32 %v1782_v58, %v1780_v50  ;;  %v4073_v2 = vmul.f32 0.020408163, %v1386_v8  ;;  %v4075_v47 = vmul.f32 0.020408163, %v1412_v31 }
  0x80   :  { %v1609_v29 = vadd.f32 %v1608_v12, %v1607_v24  ;;  %v1582_v57 = vunpack.c.l.bf16 %v5439_v7  ;;  %v1635_v39 = vadd.f32 %v1634_v55, %v1633_v51  ;;  %v1369_v40 = vadd.f32 %v1368_v25, %v1367_v10  ;;  %v4105_v24 = vld [vmem:[%s5389_s3 + $0x160] sm:$0xff]  ;;  %v4127_v25 = vld [vmem:[%s5389_s3 + $0xa8] sm:$0xff] }
  0x81   :  { %5437 = vst [vmem:[#allocation27_spill] sm:$0xff] %v4073_v2  ;;  %5438 = vst [vmem:[#allocation28_spill] sm:$0xff] %v4075_v47  ;;  %v1566_v5 = vunpack.c.l.bf16 %v5440_v43  ;;  %v1580_v56 = vunpack.c.l.bf16 %v5441_v6  ;;  %v4095_v60 = vadd.f32 %v1394_v45, %v1393_v63  ;;  %v1587_v3 = vadd.f32 %v1586_v11, %v1564_v26  ;;  %v4112_v63 = vld [vmem:[%s5389_s3 + $0x2a0] sm:$0xff]  ;;  %v4132_v26 = vld [vmem:[%s5389_s3 + $0x1e8] sm:$0xff] }
  0x82   :  { %v1798_v37 = vunpack.c.h.bf16 %v4070_v32  ;;  %v1846_v54 = vadd.f32 %v1796_v53, %v1794_v21  ;;  %v1589_v51 = vsel %vm161_vm0, %v1568_v27, 0.0  ;;  %v1613_v10 = vadd.f32 %v1612_v22, %v1578_v18  ;;  %v4137_v27 = vld [vmem:[%s5389_s3 + $0x228] sm:$0xff]  ;;  %v4168_v2 = vld [vmem:[%s5389_s3 + $0x1a0] sm:$0x11] }
  0x83   :  { %v1786_v30 = vunpack.c.h.bf16 %v4081_v41  ;;  %v1821_v19 = vadd.f32 %v1820_v0, %v1784_v36  ;;  %v4115_v42 = vmul.f32 0.020408163, %v1609_v29  ;;  %v1615_v33 = vsel %vm161_vm0, %v1582_v57, 0.0  ;;  %v5444_v36 = vld [vmem:[#allocation6_spill] sm:$0xff]  ;;  %v5445_v29 = vld [vmem:[#allocation7_spill] sm:$0xff] }
  0x84   :  { %v2003_v50 = vunpack.c.h.bf16 %v4088_v46  ;;  %v2005_v58 = vunpack.c.h.bf16 %v4093_v61  ;;  %v4120_v8 = vmul.f32 0.020408163, %v1635_v39  ;;  %v1370_v31 = vrot.slane %v1369_v40, 2  ;;  %v4146_v39 = vld [vmem:[%s5389_s3 + $0x2e0] sm:$0xff]  ;;  %v4151_v6 = vld [vmem:[%s5389_s3 + $0xe8] sm:$0xff] }
  0x85   :  { %5442 = vst [vmem:[#allocation16_spill] sm:$0xff] %v4115_v42  ;;  %v1788_v12 = vunpack.c.h.bf16 %v4100_v38  ;;  %v1790_v55 = vunpack.c.h.bf16 %v4105_v24  ;;  %v1396_v21 = vrot.slane %v4095_v60, 2  ;;  %v1588_v53 = vadd.f32 %v1587_v3, %v1566_v5  ;;  %v5447_v42 = vld [vmem:[#allocation9_spill] sm:$0xff] }
  0x86   :  { %5443 = vst [vmem:[#allocation14_spill] sm:$0xff] %v4120_v8  ;;  %v1800_v18 = vunpack.c.h.bf16 %v4112_v63  ;;  %v1847_v22 = vadd.f32 %v1846_v54, %v1798_v37  ;;  %v1614_v57 = vadd.f32 %v1613_v10, %v1580_v56  ;;  %v1822_v43 = vadd.f32 %v1821_v19, %v1786_v30  ;;  %v4161_v19 = vld [vmem:[%s5389_s3 + $0x268] sm:$0xff] }
  0x87   :  { %v2007_v37 = vunpack.c.h.bf16 %v4127_v25  ;;  %v2017_v54 = vunpack.c.h.bf16 %v4132_v26  ;;  %v2043_v56 = vadd.f32 %v2005_v58, %v2003_v50  ;;  %v4163_v8 = vadd.f32 %v1370_v31, %v1369_v40  ;;  %v4180_v31 = vld [vmem:[%s5389_s3 + $0x320] sm:$0xff] }
  0x88   :  { %v1802_v50 = vunpack.c.h.bf16 %v4146_v39  ;;  %v1848_v58 = vadd.f32 %v1847_v22, %v1800_v18  ;;  %v1823_v40 = vadd.f32 %v1822_v43, %v1788_v12  ;;  %v4185_v18 = vld [vmem:[%s5389_s3 + $0x128] sm:$0xff]  ;;  %v2021_v22 = vunpack.c.h.bf16 %v4161_v19 }
  0x89   :  { %5448 = vst [vmem:[#allocation15_spill] sm:$0xff] %v4163_v8  ;;  %v1616_v12 = vadd.f32 %v1615_v33, %v1614_v57  ;;  %v1792_v43 = vunpack.c.h.bf16 %v4168_v2  ;;  %v5449_v47 = vsub.s32 4, %v3600_v28  ;;  %v1804_v57 = vunpack.c.h.bf16 %v4180_v31  ;;  %v4231_v28 = vld [vmem:[%s5389_s3 + $0x2e8] sm:$0xff] }
  0x8a   :  { %v5452_v8 = vld [vmem:[#allocation13_spill] sm:$0xff]  ;;  %v1779_v1 = vunpack.c.l.bf16 %v4022_v34 }
  0x8b   :  { %v1617_v15 = vrot.slane %v1616_v12, 4 }
  0x8d   :  { %v4250_v16 = vadd.f32 %v1617_v15, %v1616_v12  ;;  %v1797_v15 = vunpack.c.l.bf16 %v4070_v32 }
  0xc8   :  { %v276_v45 = vpop.f32.mrf.mxu0  ;;  %v347_v11 = vpop.f32.mrf.mxu1 }
  0xc9   :  { %v277_v0 = vadd.f32 %v276_v45, %v5444_v36  ;;  %v348_v7 = vadd.f32 %v347_v11, %v5445_v29  ;;  %v2019_v45 = vunpack.c.h.bf16 %v4137_v27  ;;  %v5446_v36 = vld [vmem:[#allocation8_spill] sm:$0xff] }
  0xca   :  { %v278_v5 = vpop.f32.mrf.mxu0  ;;  %v349_v3 = vpop.f32.mrf.mxu1 }
  0xcb   :  { %v2705_v10 = vmul.f32 -1.442695, %v277_v0  ;;  %v2707_v11 = vmul.f32 -1.442695, %v348_v7  ;;  %v279_v29 = vadd.f32 %v278_v5, %v5446_v36  ;;  %v350_v30 = vadd.f32 %v349_v3, %v5447_v42  ;;  %v4175_v5 = vld [vmem:[%s5389_s3 + $0x360] sm:$0x11] }
  0xcc   :  { %v2009_v0 = vunpack.c.h.bf16 %v4151_v6  ;;  %v2044_v3 = vadd.f32 %v2043_v56, %v2007_v37  ;;  %v4202_v37 = vrot.slane %v3995_v20, %v5449_v47  ;;  %v2011_v56 = vunpack.c.h.bf16 %v4185_v18  ;;  %v4218_v47 = vld [vmem:[%s5389_s3 + $0x1a8] sm:$0x11] }
  0xcd   :  { %3004 = vpow2.f32 %v2705_v10  ;;  %v2706_v7 = vmul.f32 -1.442695, %v279_v29  ;;  %v2708_v42 = vmul.f32 -1.442695, %v350_v30  ;;  %v2069_v10 = vadd.f32 %v2019_v45, %v2017_v54 }
  0xce   :  { %3006 = vpow2.f32 %v2707_v11  ;;  %v1590_v29 = vadd.f32 %v1589_v51, %v1588_v53  ;;  %v4194_v11 = vld [vmem:[%s5389_s3 + $0x2a8] sm:$0xff]  ;;  %v4197_v30 = vadd.f32 %v1396_v21, %v4095_v60  ;;  %5450 = vst [vmem:[#allocation6_spill] sm:$0xff] %v4202_v37  ;;  %v1806_v54 = vunpack.c.h.bf16 %v4175_v5 }
  0xcf   :  { %3008 = vpow2.f32 %v2706_v7  ;;  %v4188_v36 = vpop.f32.mrf.mxu0  ;;  %v1849_v45 = vadd.f32 %v1848_v58, %v1802_v50  ;;  %v1824_v7 = vadd.f32 %v1823_v40, %v1790_v55  ;;  %v4213_v60 = vld [vmem:[%s5389_s3 + $0x168] sm:$0xff]  ;;  %v2023_v50 = vunpack.c.h.bf16 %v4194_v11  ;;  %v5451_v55 = vld [vmem:[#allocation11_spill] sm:$0xff] }
  0xd0   :  { %3010 = vpow2.f32 %v2708_v42  ;;  %v4223_v21 = vld [vmem:[%s5389_s3 + $0x368] sm:$0x11]  ;;  %v2045_v58 = vadd.f32 %v2044_v3, %v2009_v0  ;;  %v2070_v42 = vadd.f32 %v2069_v10, %v2021_v22  ;;  %v1591_v37 = vrot.slane %v1590_v29, 4 }
  0xd1   :  { %v420_v51 = vpop.f32.mrf.mxu0  ;;  %v4205_v33 = vpop.f32.mrf.mxu1  ;;  %v1825_v20 = vsel %vm161_vm0, %v1792_v43, 0.0  ;;  %v1851_v44 = vsel %vm161_vm0, %v1806_v54, 0.0  ;;  %v1781_v0 = vunpack.c.l.bf16 %v4027_v35  ;;  %v1850_v22 = vadd.f32 %v1849_v45, %v1804_v57 }
  0xd2   :  { %v421_v40 = vadd.f32 %v420_v51, %v5451_v55  ;;  %v2013_v3 = vunpack.c.h.bf16 %v4213_v60  ;;  %v2015_v10 = vunpack.c.h.bf16 %v4218_v47  ;;  %v2029_v43 = vunpack.c.h.bf16 %v4223_v21  ;;  %v4243_v55 = vld [vmem:[%s5389_s3 + $0x328] sm:$0xff] }
  0xd3   :  { %v491_v53 = vpop.f32.mrf.mxu1  ;;  %v1826_v51 = vadd.f32 %v1825_v20, %v1824_v7  ;;  %v2046_v54 = vadd.f32 %v2045_v58, %v2011_v56  ;;  %v4246_v59 = vadd.f32 %v1591_v37, %v1590_v29  ;;  %v1793_v35 = vunpack.c.l.bf16 %v4046_v4 }
  0xd4   :  { %v492_v17 = vadd.f32 %v491_v53, %v5452_v8  ;;  %v2025_v8 = vunpack.c.h.bf16 %v4231_v28  ;;  %v2071_v53 = vadd.f32 %v2070_v42, %v2023_v50  ;;  %v2710_v34 = vmul.f32 -1.442695, %v421_v40 }
  0xd5   :  { %v1795_v57 = vunpack.c.l.bf16 %v4051_v49  ;;  %v1783_v20 = vunpack.c.l.bf16 %v4060_v9  ;;  %v1807_v7 = vadd.f32 %v1781_v0, %v1779_v1  ;;  %v1852_v48 = vadd.f32 %v1851_v44, %v1850_v22  ;;  %v5453_v22 = vld [vmem:[#allocation10_spill] sm:$0xff] }
  0xd6   :  { %v2712_v45 = vmul.f32 -1.442695, %v492_v17  ;;  %v2027_v52 = vunpack.c.h.bf16 %v4243_v55  ;;  %v2048_v13 = vsel %vm161_vm0, %v2015_v10, 0.0  ;;  %v2074_v56 = vsel %vm161_vm0, %v2029_v43, 0.0  ;;  %v5454_v43 = vld [vmem:[#allocation12_spill] sm:$0xff] }
  0xd7   :  { %v1827_v29 = vrot.slane %v1826_v51, 4  ;;  %v2047_v37 = vadd.f32 %v2046_v54, %v2013_v3  ;;  %v2072_v58 = vadd.f32 %v2071_v53, %v2025_v8  ;;  %v1785_v4 = vunpack.c.l.bf16 %v4081_v41 }
  0xd8   :  { %3012 = vpow2.f32 %v2710_v34  ;;  %v1833_v9 = vadd.f32 %v1795_v57, %v1793_v35  ;;  %v1808_v12 = vadd.f32 %v1807_v7, %v1783_v20  ;;  %v2002_v42 = vunpack.c.l.bf16 %v4088_v46 }
  0xd9   :  { %3014 = vpow2.f32 %v2712_v45  ;;  %v419_v3 = vadd.f32 %v4188_v36, %v5453_v22  ;;  %v2004_v41 = vunpack.c.l.bf16 %v4093_v61  ;;  %v490_v32 = vadd.f32 %v4205_v33, %v5454_v43 }
  0xda   :  { %v3005_v50 = vpop.eup %3004  ;;  %v2073_v8 = vadd.f32 %v2072_v58, %v2027_v52  ;;  %v2049_v54 = vadd.f32 %v2048_v13, %v2047_v37  ;;  %v1799_v53 = vunpack.c.l.bf16 %v4112_v63  ;;  %v1834_v34 = vadd.f32 %v1833_v9, %v1797_v15 }
  0xdb   :  { %v3007_v49 = vpop.eup %3006  ;;  %v826_v17 = vadd.f32 1.0, %v3005_v50  ;;  %v1593_v46 = vrot.slane %v4246_v59, 2  ;;  %v1853_v35 = vrot.slane %v1852_v48, 4  ;;  %v1787_v57 = vunpack.c.l.bf16 %v4100_v38 }
  0xdc   :  { %v3009_v1 = vpop.eup %3008  ;;  %v828_v44 = vadd.f32 1.0, %v3007_v49  ;;  %v2709_v36 = vmul.f32 -1.442695, %v419_v3  ;;  %v1809_v45 = vadd.f32 %v1808_v12, %v1785_v4  ;;  %v2006_v61 = vunpack.c.l.bf16 %v4127_v25 }
  0xdd   :  { %v3011_v40 = vpop.eup %3010  ;;  %3016 = vrcp.f32 %v826_v17  ;;  %v827_v0 = vadd.f32 1.0, %v3009_v1  ;;  %v2030_v20 = vadd.f32 %v2004_v41, %v2002_v42  ;;  %v2711_v7 = vmul.f32 -1.442695, %v490_v32 }
  0xde   :  { %3018 = vrcp.f32 %v828_v44  ;;  %v829_v10 = vadd.f32 1.0, %v3011_v40  ;;  %v2075_v50 = vadd.f32 %v2074_v56, %v2073_v8  ;;  %v2016_v52 = vunpack.c.l.bf16 %v4132_v26 }
  0xdf   :  { %3020 = vrcp.f32 %v827_v0  ;;  %v2018_v13 = vunpack.c.l.bf16 %v4137_v27  ;;  %v4270_v33 = vadd.f32 %v1827_v29, %v1826_v51  ;;  %v2050_v63 = vrot.slane %v2049_v54, 4 }
  0xe0   :  { %3022 = vrcp.f32 %v829_v10  ;;  %v1801_v37 = vunpack.c.l.bf16 %v4146_v39  ;;  %v1835_v58 = vadd.f32 %v1834_v34, %v1799_v53  ;;  %v4273_v49 = vadd.f32 %v1853_v35, %v1852_v48 }
  0xe1   :  { %v1789_v38 = vunpack.c.l.bf16 %v4105_v24  ;;  %v1791_v4 = vunpack.c.l.bf16 %v4168_v2  ;;  %v1805_v25 = vunpack.c.l.bf16 %v4175_v5  ;;  %3024 = vpow2.f32 %v2709_v36 }
  0xe2   :  { %v1810_v56 = vadd.f32 %v1809_v45, %v1787_v57  ;;  %v2008_v26 = vunpack.c.l.bf16 %v4151_v6  ;;  %v2031_v17 = vadd.f32 %v2030_v20, %v2006_v61  ;;  %3026 = vpow2.f32 %v2711_v7 }
  0xe3   :  { %v2076_v27 = vrot.slane %v2075_v50, 4  ;;  %v2020_v51 = vunpack.c.l.bf16 %v4161_v19  ;;  %v2056_v29 = vadd.f32 %v2018_v13, %v2016_v52  ;;  %v1398_v39 = vrot.slane %v4197_v30, 1 }
  0xe4   :  { %v4281_v48 = vadd.f32 %v2050_v63, %v2049_v54  ;;  %v1803_v24 = vunpack.c.l.bf16 %v4180_v31  ;;  %v1836_v15 = vadd.f32 %v1835_v58, %v1801_v37  ;;  %v4285_v5 = vadd.f32 %v1593_v46, %v4246_v59  ;;  %v5455_v63 = vld [vmem:[#allocation18_spill] sm:$0xff] }
  0xe5   :  { %v3013_v2 = vpop.eup %3012  ;;  %v1619_v9 = vrot.slane %v4250_v16, 2  ;;  %v1829_v6 = vrot.slane %v4270_v33, 2  ;;  %v1855_v1 = vrot.slane %v4273_v49, 2  ;;  %v1811_v19 = vadd.f32 %v1810_v56, %v1789_v38  ;;  %v5456_v38 = vld [vmem:[#allocation19_spill] sm:$0xff] }
  0xe6   :  { %v3015_v44 = vpop.eup %3014  ;;  %v1812_v12 = vsel %vm161_vm0, %v1791_v4, 0.0  ;;  %v2010_v42 = vunpack.c.l.bf16 %v4185_v18  ;;  %v2032_v40 = vadd.f32 %v2031_v17, %v2008_v26  ;;  %v4292_v0 = vadd.f32 %v2076_v27, %v2075_v50  ;;  %v5457_v17 = vld [vmem:[#allocation17_spill] sm:$0xff] }
  0xe7   :  { %v1838_v59 = vsel %vm161_vm0, %v1805_v25, 0.0  ;;  %v2022_v22 = vunpack.c.l.bf16 %v4194_v11  ;;  %v2057_v3 = vadd.f32 %v2056_v29, %v2020_v51  ;;  %v2052_v43 = vrot.slane %v4281_v48, 2  ;;  %v560_v11 = vpop.f32.mrf.mxu0 }
  0xe8   :  { %v1837_v32 = vadd.f32 %v1836_v15, %v1803_v24  ;;  %v2014_v8 = vunpack.c.l.bf16 %v4218_v47  ;;  %v831_v53 = vadd.f32 1.0, %v3013_v2  ;;  %v2012_v18 = vunpack.c.l.bf16 %v4213_v60 }
  0xe9   :  { %v2024_v46 = vunpack.c.l.bf16 %v4231_v28  ;;  %v4301_v45 = vadd.f32 %v1812_v12, %v1811_v19  ;;  %v2033_v61 = vadd.f32 %v2032_v40, %v2010_v42  ;;  %v2026_v47 = vunpack.c.l.bf16 %v4243_v55  ;;  %v562_v56 = vpop.f32.mrf.mxu0  ;;  %v4312_v55 = vpop.f32.mrf.mxu1  ;;  %v1667_v12 = vld [vmem:[%s5390_s4 + $0x378] sm:$0xff]  ;;  %v5460_v42 = vld [vmem:[#allocation22_spill] sm:$0xff] }
  0xea   :  { %v3017_v31 = vpop.eup %3016  ;;  %v2058_v50 = vadd.f32 %v2057_v3, %v2022_v22  ;;  %v4306_v13 = vadd.f32 %v1838_v59, %v1837_v32  ;;  %v2028_v28 = vunpack.c.l.bf16 %v4223_v21  ;;  %v2035_v60 = vsel %vm161_vm0, %v2014_v8, 0.0  ;;  %v5458_v21 = vld [vmem:[#allocation26_spill] sm:$0xff]  ;;  %v1444_v3 = vld [vmem:[%s5390_s4 + $0x278] sm:$0xff] }
  0xeb   :  { %v3019_v41 = vpop.eup %3018  ;;  %v974_v10 = vrot.slane %v3017_v31, 1  ;;  %3028 = vrcp.f32 %v831_v53  ;;  %v2034_v26 = vadd.f32 %v2033_v61, %v2012_v18  ;;  %v980_v29 = vmul.f32 %v3017_v31, %v5458_v21  ;;  %v1459_v53 = vld [vmem:[%s5390_s4 + $0x2f0] sm:$0xff]  ;;  %v633_v18 = vpop.f32.mrf.mxu1  ;;  %v5467_v21 = vld [vmem:[#allocation21_spill] sm:$0xff] }
  0xec   :  { %v3021_v54 = vpop.eup %3020  ;;  %v1116_v34 = vrot.slane %v3019_v41, 1  ;;  %v2059_v24 = vadd.f32 %v2058_v50, %v2024_v46  ;;  %v561_v40 = vadd.f32 %v560_v11, %v5460_v42  ;;  %v1814_v59 = vrot.slane %v4301_v45, 4  ;;  %v1681_v11 = vld [vmem:[%s5390_s4 + $0x3e8] sm:$0xff] }
  0xed   :  { %v3023_v35 = vpop.eup %3022  ;;  %v975_v57 = vrot.slane %v3021_v54, 1  ;;  %v982_v36 = vmul.f32 %v974_v10, %v4055_v23  ;;  %v833_v23 = vadd.f32 1.0, %v3015_v44  ;;  %v981_v4 = vmul.f32 %v3021_v54, %v5456_v38  ;;  %v5459_v44 = vld [vmem:[#allocation20_spill] sm:$0xff]  ;;  %v5461_v10 = vld [vmem:[#allocation23_spill] sm:$0xff]  ;;  %v1458_v50 = vld [vmem:[%s5390_s4 + $0x2e8] sm:$0xff] }
  0xee   :  { %v1117_v20 = vrot.slane %v3023_v35, 1  ;;  %v1124_v7 = vmul.f32 %v1116_v34, %v4000_v14  ;;  %v1123_v27 = vmul.f32 %v3023_v35, %v5457_v17  ;;  %v1122_v19 = vmul.f32 %v3019_v41, %v5459_v44  ;;  %v1682_v41 = vld [vmem:[%s5390_s4 + $0x3f0] sm:$0xff] }
  0xef   :  { %v983_v52 = vmul.f32 %v975_v57, %v3986_v62  ;;  %v1243_v58 = vrot.slane %v982_v36, 7  ;;  %v3025_v62 = vpop.eup %3024  ;;  %3030 = vrcp.f32 %v833_v23  ;;  %v563_v32 = vadd.f32 %v562_v56, %v5461_v10  ;;  %v1666_v34 = vld [vmem:[%s5390_s4 + $0x370] sm:$0xff]  ;;  %v1663_v56 = vld [vmem:[%s5390_s4 + $0x358] sm:$0xff] }
  0xf0   :  { %v1125_v37 = vmul.f32 %v1117_v20, %v5455_v63  ;;  %v1162_v14 = vrot.slane %v1124_v7, 7  ;;  %v3027_v15 = vpop.eup %3026  ;;  %v830_v8 = vadd.f32 1.0, %v3025_v62  ;;  %v2078_v46 = vrot.slane %v4292_v0, 2  ;;  %v1443_v36 = vld [vmem:[%s5390_s4 + $0x270] sm:$0xff] }
  0xf1   :  { %v1245_v25 = vrot.slane %v983_v52, 7  ;;  %v1244_v31 = vsel %vm1163_vm2, %v1243_v58, %v980_v29  ;;  %v1840_v35 = vrot.slane %v4306_v13, 4  ;;  %v832_v57 = vadd.f32 1.0, %v3027_v15  ;;  %v1665_v52 = vld [vmem:[%s5390_s4 + $0x368] sm:$0xff]  ;;  %v1440_v15 = vld [vmem:[%s5390_s4 + $0x258] sm:$0xff] }
  0xf2   :  { %v1165_v51 = vrot.slane %v1125_v37, 7  ;;  %v1164_v54 = vsel %vm1163_vm2, %v1162_v14, %v1122_v19  ;;  %v4350_v61 = vadd.f32 %v1619_v9, %v4250_v16  ;;  %v4352_v20 = vadd.f32 %v2035_v60, %v2034_v26  ;;  %v1680_v60 = vld [vmem:[%s5390_s4 + $0x3e0] sm:$0xff]  ;;  %v1679_v14 = vld [vmem:[%s5390_s4 + $0x3d8] sm:$0xff] }
  0xf3   :  { %v1246_v2 = vsel %vm1163_vm2, %v1245_v25, %v981_v4  ;;  %v2060_v7 = vadd.f32 %v2059_v24, %v2026_v47  ;;  %v2713_v23 = vmul.f32 -1.442695, %v561_v40  ;;  %v1595_v63 = vrot.slane %v4285_v5, 1  ;;  %v1442_v47 = vld [vmem:[%s5390_s4 + $0x268] sm:$0xff]  ;;  %v1664_v4 = vld [vmem:[%s5390_s4 + $0x360] sm:$0xff]  ;;  %v5463_v26 = vld [vmem:[#allocation15_spill] sm:$0xff] }
  0xf4   :  { %v1166_v22 = vsel %vm1163_vm2, %v1165_v51, %v1123_v27  ;;  %1313 = vmatprep.mubr.f32.mxu1 %v1246_v2  ;;  %v4364_v16 = vadd.f32 %v1829_v6, %v4270_v33  ;;  %v2061_v9 = vsel %vm161_vm0, %v2028_v28, 0.0  ;;  %v2714_v37 = vmul.f32 -1.442695, %v563_v32  ;;  %v5462_v58 = vld [vmem:[#allocation25_spill] sm:$0xff]  ;;  %v1678_v2 = vld [vmem:[%s5390_s4 + $0x3d0] sm:$0xff] }
  0xf5   :  { %1233 = vmatprep.mubr.f32.mxu0 %v1166_v22  ;;  %1314 = vmatmul.mubr.f32.vlgmr.msra.gmra.mxu1 %v1244_v31  ;;  %v634_v38 = vadd.f32 %v633_v18, %v5462_v58  ;;  %v4377_v33 = vadd.f32 %v1855_v1, %v4273_v49  ;;  %v4380_v6 = vadd.f32 %v1814_v59, %v4301_v45  ;;  %3032 = vrcp.f32 %v830_v8  ;;  %v1457_v28 = vld [vmem:[%s5390_s4 + $0x2e0] sm:$0xff]  ;;  %v1455_v40 = vld [vmem:[%s5390_s4 + $0x2d0] sm:$0xff]  ;;  %v1454_v32 = vld [vmem:[%s5390_s4 + $0x2c8] sm:$0xff] }
  0xf6   :  { %1234 = vmatmul.mubr.f32.vlgmr.msra.gmra.mxu0 %v1164_v54  ;;  %2828 = vmatpush3.msra.mxu1 %v1667_v12  ;;  %v4391_v25 = vadd.f32 %v2052_v43, %v4281_v48  ;;  %v4394_v49 = vadd.f32 %v2078_v46, %v4292_v0  ;;  %v4397_v1 = vadd.f32 %v1840_v35, %v4306_v13  ;;  %3034 = vrcp.f32 %v832_v57  ;;  %v1441_v45 = vld [vmem:[%s5390_s4 + $0x260] sm:$0xff]  ;;  %v1456_v13 = vld [vmem:[%s5390_s4 + $0x2d8] sm:$0xff]  ;;  %v1439_v59 = vld [vmem:[%s5390_s4 + $0x250] sm:$0xff] }
  0xf7   :  { %2793 = vmatpush3.msra.mxu0 %v1444_v3  ;;  %2829 = vmatprep.subr.mxu1 %v1682_v41  ;;  %v1621_v48 = vrot.slane %v4350_v61, 1  ;;  %v2037_v43 = vrot.slane %v4352_v20, 4  ;;  %v4407_v0 = vadd.f32 %v2061_v9, %v2060_v7  ;;  %3036 = vpow2.f32 %v2713_v23  ;;  %v5465_v27 = vld [vmem:[#allocation5_spill] sm:$0xff]  ;;  %v1662_v22 = vld [vmem:[%s5390_s4 + $0x350] sm:$0xff]  ;;  %v5468_v35 = vld [vmem:[#allocation24_spill] sm:$0xff] }
  0xf8   :  { %2794 = vmatprep.subr.mxu0 %v1459_v53  ;;  %2830 = vmatpush3.msra.mxu1 %v1666_v34  ;;  %v5464_v62 = vrot.slane %v5463_v26, 1  ;;  %v5466_v51 = vsub.s32 5, %v5465_v27  ;;  %v1831_v24 = vrot.slane %v4364_v16, 1  ;;  %3038 = vpow2.f32 %v2714_v37  ;;  %v4432_v42 = vpop.eup %3028  ;;  %v1677_v8 = vld [vmem:[%s5390_s4 + $0x3c8] sm:$0xff]  ;;  %v1453_v46 = vld [vmem:[%s5390_s4 + $0x2c0] sm:$0xff]  ;;  %v1659_v37 = vld [vmem:[%s5390_s4 + $0x338] sm:$0xff] }
  0xf9   :  { %2795 = vmatpush3.msra.mxu0 %v1443_v36  ;;  %2831 = vmatprep.subr.mxu1 %v1681_v11  ;;  %v2716_v44 = vmul.f32 -1.442695, %v634_v38  ;;  %v1857_v19 = vrot.slane %v4377_v33, 1  ;;  %v1816_v12 = vrot.slane %v4380_v6, 2  ;;  %v1399_v31 = vadd.f32 %v1398_v39, %v4197_v30  ;;  %v1438_v30 = vld [vmem:[%s5390_s4 + $0x248] sm:$0xff]  ;;  %v1437_v7 = vld [vmem:[%s5390_s4 + $0x240] sm:$0xff] }
  0xfa   :  { %2796 = vmatprep.subr.mxu0 %v1458_v50  ;;  %2832 = vmatpush3.msra.mxu1 %v1665_v52  ;;  %v1373_v17 = vadd.f32 %v5464_v62, %v5463_v26  ;;  %v4421_v29 = vrot.slane %v5467_v21, %v5466_v51  ;;  %v2054_v3 = vrot.slane %v4391_v25, 1  ;;  %v2080_v41 = vrot.slane %v4394_v49, 1  ;;  %v1661_v18 = vld [vmem:[%s5390_s4 + $0x348] sm:$0xff]  ;;  %v1660_v50 = vld [vmem:[%s5390_s4 + $0x340] sm:$0xff]  ;;  %v1435_v62 = vld [vmem:[%s5390_s4 + $0x230] sm:$0xff] }
  0xfb   :  { %2797 = vmatpush3.msra.mxu0 %v1442_v47  ;;  %2833 = vmatprep.subr.mxu1 %v1680_v60  ;;  %v1842_v10 = vrot.slane %v4397_v1, 2  ;;  %v1596_v39 = vadd.f32 %v1595_v63, %v4285_v5  ;;  %v1622_v54 = vadd.f32 %v1621_v48, %v4350_v61  ;;  %v4461_v53 = vadd.f32 %v2037_v43, %v4352_v20  ;;  %v1676_v5 = vld [vmem:[%s5390_s4 + $0x3c0] sm:$0xff]  ;;  %v4497_v63 = vld [vmem:[%s5389_s3 + $0x30] sm:$0xff]  ;;  %v1452_v47 = vld [vmem:[%s5390_s4 + $0x2b8] sm:$0xff] }
  0xfc   :  { %2798 = vmatprep.subr.mxu0 %v1457_v28  ;;  %2834 = vmatpush3.msra.mxu1 %v1664_v4  ;;  %v2063_v34 = vrot.slane %v4407_v0, 4  ;;  %v632_v57 = vadd.f32 %v4312_v55, %v5468_v35  ;;  %v4475_v36 = vmul.f32 0.020408163, %v1373_v17  ;;  %v5469_v11 = vsub.s32 6, %v5465_v27  ;;  %v4504_v9 = vpop.eup %3030  ;;  %v1675_v60 = vld [vmem:[%s5390_s4 + $0x3b8] sm:$0xff]  ;;  %v1674_v4 = vld [vmem:[%s5390_s4 + $0x3b0] sm:$0xff] }
  0xfd   :  { %2799 = vmatpush3.msra.mxu0 %v1441_v45  ;;  %2835 = vmatprep.subr.mxu1 %v1679_v14  ;;  %v1832_v20 = vadd.f32 %v1831_v24, %v4364_v16  ;;  %3040 = vpow2.f32 %v2716_v44  ;;  %v1420_v55 = vrot.slane %v4432_v42, 1  ;;  %v1858_v52 = vadd.f32 %v1857_v19, %v4377_v33  ;;  %v4502_v16 = vld [vmem:[%s5389_s3 + $0x70] sm:$0xff]  ;;  %v1436_v28 = vld [vmem:[%s5390_s4 + $0x238] sm:$0xff] }
  0xfe   :  { %2800 = vmatprep.subr.mxu0 %v1456_v13  ;;  %2836 = vmatpush3.msra.mxu1 %v1663_v56  ;;  %v4480_v61 = vrot.slane %v5467_v21, %v5469_v11  ;;  %v4492_v23 = vadd.f32 %v1816_v12, %v4380_v6  ;;  %v4515_v58 = vmul.f32 0.020408163, %v1399_v31  ;;  %v2055_v38 = vadd.f32 %v2054_v3, %v4391_v25  ;;  %v1451_v48 = vld [vmem:[%s5390_s4 + $0x2b0] sm:$0xff]  ;;  %v5470_v17 = vld [vmem:[#allocation28_spill] sm:$0xff]  ;;  %v1434_v11 = vld [vmem:[%s5390_s4 + $0x228] sm:$0xff] }
  0xff   :  { %2801 = vmatpush3.msra.mxu0 %v1440_v15  ;;  %2837 = vmatprep.subr.mxu1 %v1678_v2  ;;  %v2081_v33 = vadd.f32 %v2080_v41, %v4394_v49  ;;  %v4520_v6 = vadd.f32 %v1842_v10, %v4397_v1  ;;  %v4528_v45 = vmul.f32 0.020408163, %v1596_v39  ;;  %v4530_v14 = vmul.f32 0.020408163, %v1622_v54  ;;  %v4544_v13 = vld [vmem:[%s5389_s3 + $0xb0] sm:$0xff]  ;;  %v1673_v10 = vld [vmem:[%s5390_s4 + $0x3a8] sm:$0xff] }
 0x100   :  { %2802 = vmatprep.subr.mxu0 %v1455_v40  ;;  %2838 = vmatpush3.msra.mxu1 %v1662_v22  ;;  %v2039_v25 = vrot.slane %v4461_v53, 2  ;;  %v4534_v49 = vadd.f32 %v2063_v34, %v4407_v0  ;;  %v2715_v1 = vmul.f32 -1.442695, %v632_v57  ;;  %v4539_v43 = vmul.f32 0.020408163, %v1832_v20  ;;  %v4549_v56 = vld [vmem:[%s5389_s3 + $0xf0] sm:$0xff] }
 0x101   :  { %2803 = vmatpush3.msra.mxu0 %v1439_v59  ;;  %2839 = vmatprep.subr.mxu1 %v1677_v8  ;;  %v2226_v0 = vunpack.c.h.bf16 %v4497_v63  ;;  %v2228_v26 = vunpack.c.h.bf16 %v4502_v16  ;;  %v4557_v51 = vmul.f32 %v1420_v55, %v5470_v17  ;;  %v1643_v24 = vrot.slane %v4504_v9, 1  ;;  %v4566_v44 = vld [vmem:[%s5389_s3 + $0x1f0] sm:$0xff]  ;;  %v1657_v34 = vld [vmem:[%s5390_s4 + $0x328] sm:$0xff]  ;;  %v1672_v20 = vld [vmem:[%s5390_s4 + $0x3a0] sm:$0xff] }
 0x102   :  { %2804 = vmatprep.subr.mxu0 %v1454_v32  ;;  %2840 = vmatpush3.msra.mxu1 %v1661_v18  ;;  %v4560_v15 = vmul.f32 0.020408163, %v1858_v52  ;;  %v1818_v2 = vrot.slane %v4492_v23, 1  ;;  %v4571_v19 = vld [vmem:[%s5389_s3 + $0x230] sm:$0xff]  ;;  %v5471_v40 = vsub.s32 7, %v5465_v27  ;;  %v1844_v3 = vrot.slane %v4520_v6, 1  ;;  %v4586_v41 = vpop.eup %3032 }
 0x103   :  { %2805 = vmatpush3.msra.mxu0 %v1438_v30  ;;  %2841 = vmatprep.subr.mxu1 %v1676_v5  ;;  %v1658_v12 = vld [vmem:[%s5390_s4 + $0x330] sm:$0xff]  ;;  %v4581_v22 = vmul.f32 0.020408163, %v2055_v38  ;;  %v4583_v31 = vmul.f32 0.020408163, %v2081_v33  ;;  %v4592_v32 = vadd.f32 %v2039_v25, %v4461_v53  ;;  %v2065_v27 = vrot.slane %v4534_v49, 2  ;;  %v4607_v54 = vpop.eup %3034 }
 0x104   :  { %2806 = vmatprep.subr.mxu0 %v1453_v46  ;;  %2842 = vmatpush3.msra.mxu1 %v1660_v50  ;;  %v4579_v59 = vrot.slane %v5467_v21, %v5471_v40  ;;  %v4598_v21 = vld [vmem:[%s5389_s3 + $0x130] sm:$0xff]  ;;  %v2230_v30 = vunpack.c.h.bf16 %v4544_v13  ;;  %v2232_v39 = vunpack.c.h.bf16 %v4549_v56  ;;  %3042 = vpow2.f32 %v2715_v1  ;;  %v1450_v53 = vld [vmem:[%s5390_s4 + $0x2a8] sm:$0xff]  ;;  %v3037_v57 = vpop.eup %3036  ;;  %v1449_v38 = vld [vmem:[%s5390_s4 + $0x2a0] sm:$0xff] }
 0x105   :  { %2807 = vmatpush3.msra.mxu0 %v1437_v7  ;;  %2843 = vmatprep.subr.mxu1 %v1675_v60  ;;  %v4603_v8 = vld [vmem:[%s5389_s3 + $0x170] sm:$0xff]  ;;  %v2240_v46 = vunpack.c.h.bf16 %v4566_v44  ;;  %v2242_v5 = vunpack.c.h.bf16 %v4571_v19  ;;  %v2266_v35 = vadd.f32 %v2228_v26, %v2226_v0  ;;  %v1467_v55 = vrot.slane %v4557_v51, 7  ;;  %v1433_v33 = vld [vmem:[%s5390_s4 + $0x220] sm:$0xff]  ;;  %v1448_v1 = vld [vmem:[%s5390_s4 + $0x298] sm:$0xff]  ;;  %v702_v26 = vpop.f32.mrf.mxu0 }
 0x106   :  { %2808 = vmatprep.subr.mxu0 %v1452_v47  ;;  %2844 = vmatpush3.msra.mxu1 %v1659_v37  ;;  %v4618_v18 = vld [vmem:[%s5389_s3 + $0x270] sm:$0xff]  ;;  %v1819_v60 = vadd.f32 %v1818_v2, %v4492_v23  ;;  %v3039_v37 = vpop.eup %3038  ;;  %v2234_v23 = vunpack.c.h.bf16 %v4598_v21  ;;  %v2236_v25 = vunpack.c.h.bf16 %v4603_v8  ;;  %v1642_v0 = vrot.slane %v4607_v54, 1  ;;  %v1655_v2 = vld [vmem:[%s5390_s4 + $0x318] sm:$0xff] }
 0x107   :  { %2809 = vmatpush3.msra.mxu0 %v1436_v28  ;;  %2845 = vmatprep.subr.mxu1 %v1674_v4  ;;  %v5472_v7 = vld [vmem:[#allocation27_spill] sm:$0xff]  ;;  %v5473_v52 = vld [vmem:[#allocation14_spill] sm:$0xff]  ;;  %v1419_v28 = vrot.slane %v4586_v41, 1  ;;  %v1845_v4 = vadd.f32 %v1844_v3, %v4520_v6  ;;  %v4657_v6 = vadd.f32 %v2065_v27, %v4534_v49  ;;  %v2244_v51 = vunpack.c.h.bf16 %v4618_v18  ;;  %v773_v3 = vpop.f32.mrf.mxu1 }
 0x108   :  { %2810 = vmatprep.subr.mxu0 %v1451_v48  ;;  %2846 = vmatpush3.msra.mxu1 %v1658_v12  ;;  %v1426_v50 = vmul.f32 %v4432_v42, %v5472_v7  ;;  %v4632_v47 = vmul.f32 %v1643_v24, %v5473_v52  ;;  %v1656_v42 = vld [vmem:[%s5390_s4 + $0x320] sm:$0xff]  ;;  %v1671_v48 = vld [vmem:[%s5390_s4 + $0x398] sm:$0xff]  ;;  %v4662_v17 = vld [vmem:[%s5389_s3 + $0x1b0] sm:$0x11]  ;;  %v834_v24 = vadd.f32 1.0, %v3037_v57  ;;  %v2267_v27 = vadd.f32 %v2266_v35, %v2230_v30 }
 0x109   :  { %2811 = vmatpush3.msra.mxu0 %v1435_v62  ;;  %2847 = vmatprep.subr.mxu1 %v1673_v10  ;;  %v2041_v62 = vrot.slane %v4592_v32, 1  ;;  %v5474_v12 = vld [vmem:[#allocation6_spill] sm:$0xff]  ;;  %v1432_v57 = vld [vmem:[%s5390_s4 + $0x218] sm:$0xff]  ;;  %v4695_v35 = vmul.f32 0.020408163, %v1819_v60  ;;  %v4710_v60 = vmul.f32 %v1642_v0, %v4530_v14 }
 0x10a   :  { %2812 = vmatprep.subr.mxu0 %v1450_v53  ;;  %2848 = vmatpush3.msra.mxu1 %v1657_v34  ;;  %v703_v40 = vadd.f32 %v702_v26, %v5474_v12  ;;  %v4672_v49 = vld [vmem:[%s5389_s3 + $0x2b0] sm:$0xff]  ;;  %v2292_v53 = vadd.f32 %v2242_v5, %v2240_v46  ;;  %v835_v34 = vadd.f32 1.0, %v3039_v37  ;;  %v1690_v52 = vrot.slane %v4632_v47, 7  ;;  %v3041_v26 = vpop.eup %3040  ;;  %v704_v37 = vpop.f32.mrf.mxu0 }
 0x10b   :  { %2813 = vmatpush3.msra.mxu0 %v1434_v11  ;;  %2849 = vmatprep.subr.mxu1 %v1672_v20  ;;  %v4677_v10 = vld [vmem:[%s5389_s3 + $0x2f0] sm:$0xff]  ;;  %v1468_v11 = vsel %vm1163_vm2, %v1467_v55, %v1426_v50  ;;  %v5475_v20 = vld [vmem:[#allocation16_spill] sm:$0xff]  ;;  %v4693_v5 = vmul.f32 %v1419_v28, %v4515_v58  ;;  %v4697_v50 = vmul.f32 0.020408163, %v1845_v4  ;;  %v1446_v58 = vld [vmem:[%s5390_s4 + $0x288] sm:$0xff]  ;;  %3044 = vrcp.f32 %v834_v24 }
 0x10c   :  { %2814 = vmatprep.subr.mxu0 %v1449_v38  ;;  %2850 = vmatpush3.msra.mxu1 %v1656_v42  ;;  %v1649_v7 = vmul.f32 %v4504_v9, %v5475_v20  ;;  %v1447_v30 = vld [vmem:[%s5390_s4 + $0x290] sm:$0xff]  ;;  %v2238_v9 = vunpack.c.h.bf16 %v4662_v17  ;;  %v2067_v38 = vrot.slane %v4657_v6, 1  ;;  %v2248_v42 = vunpack.c.h.bf16 %v4677_v10  ;;  %v1669_v28 = vld [vmem:[%s5390_s4 + $0x388] sm:$0xff]  ;;  %v4727_v24 = vld [vmem:[%s5389_s3 + $0x1f8] sm:$0xff] }
 0x10d   :  { %2815 = vmatpush3.msra.mxu0 %v1433_v33  ;;  %2851 = vmatprep.subr.mxu1 %v1671_v48  ;;  %v1670_v46 = vld [vmem:[%s5390_s4 + $0x390] sm:$0xff]  ;;  %v2246_v33 = vunpack.c.h.bf16 %v4672_v49  ;;  %v1430_v4 = vld [vmem:[%s5390_s4 + $0x208] sm:$0xff]  ;;  %v2717_v14 = vmul.f32 -1.442695, %v703_v40  ;;  %v2042_v48 = vadd.f32 %v2041_v62, %v4592_v32  ;;  %v2268_v0 = vadd.f32 %v2267_v27, %v2232_v39  ;;  %v4743_v62 = vld [vmem:[%s5389_s3 + $0x238] sm:$0xff] }
 0x10e   :  { %2816 = vmatprep.subr.mxu0 %v1448_v1  ;;  %2852 = vmatpush3.msra.mxu1 %v1655_v2  ;;  %v1431_v55 = vld [vmem:[%s5390_s4 + $0x210] sm:$0xff]  ;;  %v775_v1 = vpop.f32.mrf.mxu1  ;;  %3046 = vrcp.f32 %v835_v34  ;;  %v837_v2 = vadd.f32 1.0, %v3041_v26  ;;  %v1691_v12 = vsel %vm1163_vm2, %v1690_v52, %v1649_v7  ;;  %v2293_v39 = vadd.f32 %v2292_v53, %v2244_v51  ;;  %v1653_v27 = vld [vmem:[%s5390_s4 + $0x308] sm:$0xff]  ;;  %v1445_v34 = vld [vmem:[%s5390_s4 + $0x280] sm:$0xff] }
 0x10f   :  { %v1654_v47 = vld [vmem:[%s5390_s4 + $0x310] sm:$0xff]  ;;  %2817 = vmatpush3.msra.mxu0 %v1432_v57  ;;  %1535 = vmatprep.mubr.f32.mxu0 %v1468_v11  ;;  %v1425_v57 = vmul.f32 %v4586_v41, %v4475_v36  ;;  %v1465_v51 = vrot.slane %v4693_v5, 7  ;;  %v705_v53 = vadd.f32 %v704_v37, %v4421_v29  ;;  %v774_v11 = vadd.f32 %v773_v3, %v4480_v61  ;;  %v1668_v20 = vld [vmem:[%s5390_s4 + $0x380] sm:$0xff]  ;;  %v1906_v52 = vld [vmem:[%s5390_s4 + $0x4f8] sm:$0xff] }
 0x110   :  { %2818 = vmatprep.subr.mxu0 %v1447_v30  ;;  %2853 = vmatprep.subr.mxu1 %v1670_v46  ;;  %v4733_v40 = vld [vmem:[%s5389_s3 + $0x330] sm:$0xff]  ;;  %v1429_v7 = vld [vmem:[%s5390_s4 + $0x200] sm:$0xff]  ;;  %v1648_v41 = vmul.f32 %v4607_v54, %v4528_v45  ;;  %v1688_v29 = vrot.slane %v4710_v60, 7  ;;  %v776_v61 = vadd.f32 %v775_v1, %v4579_v59  ;;  %v2068_v3 = vadd.f32 %v2067_v38, %v4657_v6  ;;  %v2129_v26 = vld [vmem:[%s5390_s4 + $0x5f8] sm:$0xff] }
 0x111   :  { %v4738_v32 = vld [vmem:[%s5389_s3 + $0x370] sm:$0x11]  ;;  %2819 = vmatpush3.msra.mxu0 %v1431_v55  ;;  %2854 = vmatpush3.msra.mxu1 %v1654_v47  ;;  %v1652_v36 = vld [vmem:[%s5390_s4 + $0x300] sm:$0xff]  ;;  %v2250_v30 = vunpack.c.h.bf16 %v4733_v40  ;;  %v4781_v59 = vld [vmem:[%s5389_s3 + $0x38] sm:$0xff]  ;;  %v2463_v54 = vunpack.c.h.bf16 %v4727_v24  ;;  %v2465_v6 = vunpack.c.h.bf16 %v4743_v62  ;;  %v3043_v46 = vpop.eup %3042  ;;  %3048 = vrcp.f32 %v837_v2 }
 0x112   :  { %2820 = vmatprep.subr.mxu0 %v1446_v58  ;;  %2855 = vmatprep.subr.mxu1 %v1669_v28  ;;  %v2252_v45 = vunpack.c.h.bf16 %v4738_v32  ;;  %v1890_v5 = vld [vmem:[%s5390_s4 + $0x478] sm:$0xff]  ;;  %v4788_v55 = vmul.f32 0.020408163, %v2042_v48  ;;  %v2269_v47 = vadd.f32 %v2268_v0, %v2234_v23  ;;  %v2294_v58 = vadd.f32 %v2293_v39, %v2246_v33  ;;  %v1905_v23 = vld [vmem:[%s5390_s4 + $0x4f0] sm:$0xff] }
 0x113   :  { %1758 = vmatprep.mubr.f32.mxu1 %v1691_v12  ;;  %2821 = vmatpush3.msra.mxu0 %v1430_v4  ;;  %v4795_v60 = vld [vmem:[%s5389_s3 + $0x78] sm:$0xff]  ;;  %v1466_v38 = vsel %vm1163_vm2, %v1465_v51, %v1425_v57  ;;  %3050 = vpow2.f32 %v2717_v14  ;;  %v2718_v33 = vmul.f32 -1.442695, %v705_v53  ;;  %v2719_v4 = vmul.f32 -1.442695, %v774_v11  ;;  %v2128_v48 = vld [vmem:[%s5390_s4 + $0x5f0] sm:$0xff] }
 0x114   :  { %2856 = vmatpush3.msra.mxu1 %v1653_v27  ;;  %2822 = vmatprep.subr.mxu0 %v1445_v34  ;;  %v4800_v37 = vld [vmem:[%s5389_s3 + $0x278] sm:$0xff]  ;;  %v1689_v1 = vsel %vm1163_vm2, %v1688_v29, %v1648_v41  ;;  %v4813_v0 = vmul.f32 -1.442695, %v776_v61  ;;  %v4815_v2 = vmul.f32 0.020408163, %v2068_v3  ;;  %v2449_v14 = vunpack.c.h.bf16 %v4781_v59  ;;  %v1889_v27 = vld [vmem:[%s5390_s4 + $0x470] sm:$0xff] }
 0x115   :  { %2857 = vmatprep.subr.mxu1 %v1668_v20  ;;  %2823 = vmatpush3.msra.mxu0 %v1429_v7  ;;  %v2113_v28 = vld [vmem:[%s5390_s4 + $0x578] sm:$0xff]  ;;  %v836_v39 = vadd.f32 1.0, %v3043_v46  ;;  %v2112_v34 = vld [vmem:[%s5390_s4 + $0x570] sm:$0xff]  ;;  %v2451_v51 = vunpack.c.h.bf16 %v4795_v60  ;;  %v2467_v53 = vunpack.c.h.bf16 %v4800_v37  ;;  %v2515_v11 = vadd.f32 %v2465_v6, %v2463_v54  ;;  %v1904_v20 = vld [vmem:[%s5390_s4 + $0x4e8] sm:$0xff] }
 0x116   :  { %2858 = vmatpush3.msra.mxu1 %v1652_v36  ;;  %1536 = vmatmul.mubr.f32.vlgmr.msra.gmra.mxu0 %v1466_v38  ;;  %v4820_v12 = vld [vmem:[%s5389_s3 + $0xb8] sm:$0xff]  ;;  %v2127_v7 = vld [vmem:[%s5390_s4 + $0x5e8] sm:$0xff]  ;;  %v2270_v36 = vadd.f32 %v2269_v47, %v2236_v25  ;;  %v2271_v41 = vsel %vm161_vm0, %v2238_v9, 0.0  ;;  %v2295_v29 = vadd.f32 %v2294_v58, %v2248_v42  ;;  %v4850_v61 = vsel %vm161_vm0, %v2252_v45, 0.0  ;;  %v1903_v6 = vld [vmem:[%s5390_s4 + $0x4e0] sm:$0xff] }
 0x117   :  { %1759 = vmatmul.mubr.f32.vlgmr.msra.gmra.mxu1 %v1689_v1  ;;  %2862 = vmatprep.subr.mxu0 %v1906_v52  ;;  %v4832_v57 = vld [vmem:[%s5389_s3 + $0xf8] sm:$0xff]  ;;  %v1888_v25 = vld [vmem:[%s5390_s4 + $0x468] sm:$0xff]  ;;  %3052 = vpow2.f32 %v2718_v33  ;;  %v2453_v52 = vunpack.c.h.bf16 %v4820_v12  ;;  %v2241_v45 = vunpack.c.l.bf16 %v4571_v19  ;;  %v2464_v47 = vunpack.c.l.bf16 %v4743_v62  ;;  %v1887_v19 = vld [vmem:[%s5390_s4 + $0x460] sm:$0xff] }
 0x118   :  { %2897 = vmatprep.subr.mxu1 %v2129_v26  ;;  %2863 = vmatpush3.msra.mxu0 %v1890_v5  ;;  %v4855_v3 = vld [vmem:[%s5389_s3 + $0x2b8] sm:$0xff]  ;;  %v2239_v26 = vunpack.c.l.bf16 %v4566_v44  ;;  %v2111_v54 = vld [vmem:[%s5390_s4 + $0x568] sm:$0xff]  ;;  %3054 = vpow2.f32 %v2719_v4  ;;  %v2455_v46 = vunpack.c.h.bf16 %v4832_v57  ;;  %v2462_v5 = vunpack.c.l.bf16 %v4727_v24  ;;  %v2126_v44 = vld [vmem:[%s5390_s4 + $0x5e0] sm:$0xff] }
 0x119   :  { %2898 = vmatpush3.msra.mxu1 %v2113_v28  ;;  %2864 = vmatprep.subr.mxu0 %v1905_v23  ;;  %v4863_v9 = vld [vmem:[%s5389_s3 + $0x138] sm:$0xff]  ;;  %3056 = vrcp.f32 %v836_v39  ;;  %v2469_v58 = vunpack.c.h.bf16 %v4855_v3  ;;  %v2489_v38 = vadd.f32 %v2451_v51, %v2449_v14  ;;  %v2516_v28 = vadd.f32 %v2515_v11, %v2467_v53  ;;  %v4889_v23 = vpop.eup %3044  ;;  %v2110_v24 = vld [vmem:[%s5390_s4 + $0x560] sm:$0xff] }
 0x11a   :  { %v4868_v42 = vld [vmem:[%s5389_s3 + $0x178] sm:$0xff]  ;;  %2899 = vmatprep.subr.mxu1 %v2128_v48  ;;  %2865 = vmatpush3.msra.mxu0 %v1889_v27  ;;  %v4897_v33 = vadd.f32 %v2271_v41, %v2270_v36  ;;  %v2296_v4 = vadd.f32 %v2295_v29, %v2250_v30  ;;  %v2457_v48 = vunpack.c.h.bf16 %v4863_v9  ;;  %v2227_v51 = vunpack.c.l.bf16 %v4502_v16  ;;  %v1885_v29 = vld [vmem:[%s5390_s4 + $0x450] sm:$0xff] }
 0x11b   :  { %2900 = vmatpush3.msra.mxu1 %v2112_v34  ;;  %2866 = vmatprep.subr.mxu0 %v1904_v20  ;;  %v1902_v62 = vld [vmem:[%s5390_s4 + $0x4d8] sm:$0xff]  ;;  %v2459_v14 = vunpack.c.h.bf16 %v4868_v42  ;;  %v4908_v39 = vpop.eup %3046  ;;  %v2225_v34 = vunpack.c.l.bf16 %v4497_v63  ;;  %v2243_v53 = vunpack.c.l.bf16 %v4618_v18  ;;  %v2279_v11 = vadd.f32 %v2241_v45, %v2239_v26  ;;  %v2124_v18 = vld [vmem:[%s5390_s4 + $0x5d0] sm:$0xff] }
 0x11c   :  { %2901 = vmatprep.subr.mxu1 %v2127_v7  ;;  %2867 = vmatpush3.msra.mxu0 %v1888_v25  ;;  %v4904_v1 = vld [vmem:[%s5389_s3 + $0x2f8] sm:$0xff]  ;;  %v1901_v7 = vld [vmem:[%s5390_s4 + $0x4d0] sm:$0xff]  ;;  %v2448_v36 = vunpack.c.l.bf16 %v4781_v59  ;;  %v2450_v41 = vunpack.c.l.bf16 %v4795_v60  ;;  %v2466_v63 = vunpack.c.l.bf16 %v4800_v37  ;;  %v2502_v16 = vadd.f32 %v2464_v47, %v2462_v5  ;;  %v1900_v37 = vld [vmem:[%s5390_s4 + $0x4c8] sm:$0xff] }
 0x11d   :  { %2902 = vmatpush3.msra.mxu1 %v2111_v54  ;;  %2868 = vmatprep.subr.mxu0 %v1903_v6  ;;  %v2125_v27 = vld [vmem:[%s5390_s4 + $0x5d8] sm:$0xff]  ;;  %v1865_v25 = vrot.slane %v4889_v23, 1  ;;  %v2471_v26 = vunpack.c.h.bf16 %v4904_v1  ;;  %v2490_v59 = vadd.f32 %v2489_v38, %v2453_v52  ;;  %v2517_v45 = vadd.f32 %v2516_v28, %v2469_v58  ;;  %v2108_v60 = vld [vmem:[%s5390_s4 + $0x550] sm:$0xff] }
 0x11e   :  { %v1886_v30 = vld [vmem:[%s5390_s4 + $0x458] sm:$0xff]  ;;  %2903 = vmatprep.subr.mxu1 %v2126_v44  ;;  %2869 = vmatpush3.msra.mxu0 %v1887_v19  ;;  %3058 = vpow2.f32 %v4813_v0  ;;  %v1866_v54 = vrot.slane %v4908_v39, 1  ;;  %v2273_v6 = vrot.slane %v4897_v33, 4  ;;  %v4946_v5 = vadd.f32 %v4850_v61, %v2296_v4  ;;  %v4953_v47 = vpop.eup %3048  ;;  %v2123_v0 = vld [vmem:[%s5390_s4 + $0x5c8] sm:$0xff]  ;;  %v1899_v4 = vld [vmem:[%s5390_s4 + $0x4c0] sm:$0xff] }
 0x11f   :  { %v2109_v20 = vld [vmem:[%s5390_s4 + $0x558] sm:$0xff]  ;;  %2904 = vmatpush3.msra.mxu1 %v2110_v24  ;;  %2870 = vmatprep.subr.mxu0 %v1902_v62  ;;  %v1884_v44 = vld [vmem:[%s5390_s4 + $0x448] sm:$0xff]  ;;  %v2229_v19 = vunpack.c.l.bf16 %v4544_v13  ;;  %v2245_v58 = vunpack.c.l.bf16 %v4672_v49  ;;  %v2253_v38 = vadd.f32 %v2227_v51, %v2225_v34  ;;  %v2280_v28 = vadd.f32 %v2279_v11, %v2243_v53  ;;  %v2122_v34 = vld [vmem:[%s5390_s4 + $0x5c0] sm:$0xff] }
 0x120   :  { %2905 = vmatprep.subr.mxu1 %v2125_v27  ;;  %2871 = vmatpush3.msra.mxu0 %v1886_v30  ;;  %v4951_v52 = vld [vmem:[%s5389_s3 + $0x338] sm:$0xff]  ;;  %v4968_v24 = vpop.eup %3050  ;;  %v2107_v62 = vld [vmem:[%s5390_s4 + $0x548] sm:$0xff]  ;;  %v2452_v27 = vunpack.c.l.bf16 %v4820_v12  ;;  %v2468_v13 = vunpack.c.l.bf16 %v4855_v3  ;;  %v2476_v30 = vadd.f32 %v2450_v41, %v2448_v36  ;;  %v2503_v49 = vadd.f32 %v2502_v16, %v2466_v63  ;;  %v1883_v51 = vld [vmem:[%s5390_s4 + $0x440] sm:$0xff] }
 0x121   :  { %2906 = vmatpush3.msra.mxu1 %v2109_v20  ;;  %2872 = vmatprep.subr.mxu0 %v1901_v7  ;;  %v4964_v61 = vld [vmem:[%s5389_s3 + $0x378] sm:$0x11]  ;;  %v4985_v53 = vmul.f32 %v1865_v25, %v4697_v50  ;;  %v2473_v11 = vunpack.c.h.bf16 %v4951_v52  ;;  %v2491_v12 = vadd.f32 %v2490_v59, %v2455_v46  ;;  %v2518_v3 = vadd.f32 %v2517_v45, %v2471_v26  ;;  %v2106_v20 = vld [vmem:[%s5390_s4 + $0x540] sm:$0xff] }
 0x122   :  { %2907 = vmatprep.subr.mxu1 %v2124_v18  ;;  %2873 = vmatpush3.msra.mxu0 %v1885_v29  ;;  %v1898_v7 = vld [vmem:[%s5390_s4 + $0x4b8] sm:$0xff]  ;;  %v4997_v36 = vmul.f32 %v1866_v54, %v4560_v15  ;;  %v2089_v50 = vrot.slane %v4953_v47, 1  ;;  %v2299_v41 = vrot.slane %v4946_v5, 4  ;;  %v2475_v63 = vunpack.c.h.bf16 %v4964_v61 }
 0x123   :  { %2908 = vmatpush3.msra.mxu1 %v2108_v60  ;;  %2874 = vmatprep.subr.mxu0 %v1900_v37  ;;  %v5004_v46 = vld [vmem:[%s5389_s3 + $0x1b8] sm:$0x11]  ;;  %v2231_v18 = vunpack.c.l.bf16 %v4549_v56  ;;  %v2247_v29 = vunpack.c.l.bf16 %v4677_v10  ;;  %v2254_v25 = vadd.f32 %v2253_v38, %v2229_v19  ;;  %v2281_v26 = vadd.f32 %v2280_v28, %v2245_v58  ;;  %v1897_v60 = vld [vmem:[%s5390_s4 + $0x4b0] sm:$0xff] }
 0x124   :  { %2909 = vmatprep.subr.mxu1 %v2123_v0  ;;  %2875 = vmatpush3.msra.mxu0 %v1884_v44  ;;  %v2121_v16 = vld [vmem:[%s5390_s4 + $0x5b8] sm:$0xff]  ;;  %v5015_v59 = vpop.eup %3052  ;;  %v2454_v37 = vunpack.c.l.bf16 %v4832_v57  ;;  %v2470_v56 = vunpack.c.l.bf16 %v4904_v1  ;;  %v2477_v54 = vadd.f32 %v2476_v30, %v2452_v27  ;;  %v2504_v10 = vadd.f32 %v2503_v49, %v2468_v13  ;;  %v2120_v44 = vld [vmem:[%s5390_s4 + $0x5b0] sm:$0xff]  ;;  %v2119_v13 = vld [vmem:[%s5390_s4 + $0x5a8] sm:$0xff] }
 0x125   :  { %2910 = vmatpush3.msra.mxu1 %v2107_v62  ;;  %2876 = vmatprep.subr.mxu0 %v1899_v4  ;;  %v1882_v15 = vld [vmem:[%s5390_s4 + $0x438] sm:$0xff]  ;;  %v5025_v0 = vpop.eup %3054  ;;  %v1881_v19 = vld [vmem:[%s5390_s4 + $0x430] sm:$0xff]  ;;  %v1872_v58 = vmul.f32 %v4908_v39, %v4539_v43  ;;  %v2461_v57 = vunpack.c.h.bf16 %v5004_v46  ;;  %v2492_v1 = vadd.f32 %v2491_v12, %v2457_v48  ;;  %v2519_v38 = vadd.f32 %v2518_v3, %v2473_v11  ;;  %v1896_v4 = vld [vmem:[%s5390_s4 + $0x4a8] sm:$0xff] }
 0x126   :  { %2911 = vmatprep.subr.mxu1 %v2122_v34  ;;  %2877 = vmatpush3.msra.mxu0 %v1883_v51  ;;  %v2105_v45 = vld [vmem:[%s5390_s4 + $0x538] sm:$0xff]  ;;  %v5038_v28 = vpop.eup %3056  ;;  %v2104_v62 = vld [vmem:[%s5390_s4 + $0x530] sm:$0xff]  ;;  %v1913_v43 = vrot.slane %v4997_v36, 7  ;;  %v5048_v39 = vmul.f32 %v2089_v50, %v4583_v31  ;;  %v2520_v48 = vsel %vm161_vm0, %v2475_v63, 0.0  ;;  %v2233_v27 = vunpack.c.l.bf16 %v4598_v21  ;;  %v1880_v30 = vld [vmem:[%s5390_s4 + $0x428] sm:$0xff] }
 0x127   :  { %2912 = vmatpush3.msra.mxu1 %v2106_v20  ;;  %2878 = vmatprep.subr.mxu0 %v1898_v7  ;;  %v2249_v49 = vunpack.c.l.bf16 %v4733_v40  ;;  %v2251_v34 = vunpack.c.l.bf16 %v4738_v32  ;;  %v2255_v31 = vadd.f32 %v2254_v25, %v2231_v18  ;;  %v2282_v51 = vadd.f32 %v2281_v26, %v2247_v29  ;;  %v2103_v21 = vld [vmem:[%s5390_s4 + $0x528] sm:$0xff]  ;;  %v1895_v11 = vld [vmem:[%s5390_s4 + $0x4a0] sm:$0xff]  ;;  %v2117_v25 = vld [vmem:[%s5390_s4 + $0x598] sm:$0xff] }
 0x128   :  { %2913 = vmatprep.subr.mxu1 %v2121_v16  ;;  %2879 = vmatpush3.msra.mxu0 %v1882_v15  ;;  %v2456_v12 = vunpack.c.l.bf16 %v4863_v9  ;;  %v2472_v3 = vunpack.c.l.bf16 %v4951_v52  ;;  %v2478_v20 = vadd.f32 %v2477_v54, %v2454_v37  ;;  %v2505_v40 = vadd.f32 %v2504_v10, %v2470_v56  ;;  %v2118_v32 = vld [vmem:[%s5390_s4 + $0x5a0] sm:$0xff]  ;;  %v1894_v16 = vld [vmem:[%s5390_s4 + $0x498] sm:$0xff]  ;;  %v1893_v56 = vld [vmem:[%s5390_s4 + $0x490] sm:$0xff] }
 0x129   :  { %2914 = vmatpush3.msra.mxu1 %v2105_v45  ;;  %2880 = vmatprep.subr.mxu0 %v1897_v60  ;;  %v1879_v7 = vld [vmem:[%s5390_s4 + $0x420] sm:$0xff]  ;;  %v2088_v36 = vrot.slane %v5038_v28, 1  ;;  %v2493_v50 = vadd.f32 %v2492_v1, %v2459_v14  ;;  %v5077_v9 = vadd.f32 %v2520_v48, %v2519_v38  ;;  %v2474_v52 = vunpack.c.l.bf16 %v4964_v61  ;;  %v1878_v26 = vld [vmem:[%s5390_s4 + $0x418] sm:$0xff] }
 0x12a   :  { %2915 = vmatprep.subr.mxu1 %v2120_v44  ;;  %2881 = vmatpush3.msra.mxu0 %v1881_v19  ;;  %v2102_v63 = vld [vmem:[%s5390_s4 + $0x520] sm:$0xff]  ;;  %v1914_v15 = vsel %vm1163_vm2, %v1913_v43, %v1872_v58  ;;  %v2095_v18 = vmul.f32 %v4953_v47, %v4581_v22  ;;  %v2136_v14 = vrot.slane %v5048_v39, 7  ;;  %v2494_v29 = vsel %vm161_vm0, %v2461_v57, 0.0  ;;  %v2101_v37 = vld [vmem:[%s5390_s4 + $0x518] sm:$0xff]  ;;  %v1892_v39 = vld [vmem:[%s5390_s4 + $0x488] sm:$0xff] }
 0x12b   :  { %2916 = vmatpush3.msra.mxu1 %v2104_v62  ;;  %2882 = vmatprep.subr.mxu0 %v1896_v4  ;;  %v3059_v61 = vpop.eup %3058  ;;  %v2235_v45 = vunpack.c.l.bf16 %v4603_v8  ;;  %v2237_v60 = vunpack.c.l.bf16 %v4662_v17  ;;  %v2256_v22 = vadd.f32 %v2255_v31, %v2233_v27  ;;  %v2283_v47 = vadd.f32 %v2282_v51, %v2249_v49  ;;  %v2116_v17 = vld [vmem:[%s5390_s4 + $0x590] sm:$0xff] }
 0x12c   :  { %2917 = vmatprep.subr.mxu1 %v2119_v13  ;;  %2883 = vmatpush3.msra.mxu0 %v1880_v30  ;;  %v2284_v54 = vsel %vm161_vm0, %v2251_v34, 0.0  ;;  %v2458_v10 = vunpack.c.l.bf16 %v4868_v42  ;;  %v2479_v44 = vadd.f32 %v2478_v20, %v2456_v12  ;;  %v2506_v8 = vadd.f32 %v2505_v40, %v2472_v3  ;;  %v1877_v42 = vld [vmem:[%s5390_s4 + $0x410] sm:$0xff]  ;;  %v2098_v20 = vld [vmem:[%s5390_s4 + $0x500] sm:$0xff] }
 0x12d   :  { %2918 = vmatpush3.msra.mxu1 %v2103_v21  ;;  %2884 = vmatprep.subr.mxu0 %v1895_v11  ;;  %v2495_v19 = vadd.f32 %v2494_v29, %v2493_v50  ;;  %v2522_v58 = vrot.slane %v5077_v9, 4  ;;  %v2460_v57 = vunpack.c.l.bf16 %v5004_v46  ;;  %v2507_v1 = vsel %vm161_vm0, %v2474_v52, 0.0  ;;  %v2100_v62 = vld [vmem:[%s5390_s4 + $0x510] sm:$0xff]  ;;  %v2114_v21 = vld [vmem:[%s5390_s4 + $0x580] sm:$0xff] }
 0x12e   :  { %2919 = vmatprep.subr.mxu1 %v2118_v32  ;;  %2885 = vmatpush3.msra.mxu0 %v1879_v7  ;;  %v839_v38 = vadd.f32 1.0, %v5015_v59  ;;  %v2096_v4 = vmul.f32 %v2088_v36, %v4815_v2  ;;  %v5124_v46 = vadd.f32 %v2273_v6, %v4897_v33  ;;  %v2300_v59 = vadd.f32 %v2299_v41, %v4946_v5  ;;  %v2115_v2 = vld [vmem:[%s5390_s4 + $0x588] sm:$0xff]  ;;  %v1875_v11 = vld [vmem:[%s5390_s4 + $0x400] sm:$0xff]  ;;  %v2352_v7 = vld [vmem:[%s5390_s4 + $0x6f8] sm:$0xff] }
 0x12f   :  { %2920 = vmatpush3.msra.mxu1 %v2102_v63  ;;  %2886 = vmatprep.subr.mxu0 %v1894_v16  ;;  %v841_v43 = vadd.f32 1.0, %v3059_v61  ;;  %v1871_v48 = vmul.f32 %v4889_v23, %v4695_v35  ;;  %v2257_v33 = vadd.f32 %v2256_v22, %v2235_v45  ;;  %v2285_v6 = vadd.f32 %v2284_v54, %v2283_v47  ;;  %v1876_v41 = vld [vmem:[%s5390_s4 + $0x408] sm:$0xff]  ;;  %v1891_v23 = vld [vmem:[%s5390_s4 + $0x480] sm:$0xff] }
 0x130   :  { %2921 = vmatprep.subr.mxu1 %v2117_v25  ;;  %2887 = vmatpush3.msra.mxu0 %v1878_v26  ;;  %v2137_v5 = vsel %vm1163_vm2, %v2136_v14, %v2095_v18  ;;  %v2258_v27 = vsel %vm161_vm0, %v2237_v60, 0.0  ;;  %v2480_v13 = vadd.f32 %v2479_v44, %v2458_v10  ;;  %v2508_v30 = vadd.f32 %v2507_v1, %v2506_v8  ;;  %v2099_v35 = vld [vmem:[%s5390_s4 + $0x508] sm:$0xff]  ;;  %v2351_v18 = vld [vmem:[%s5390_s4 + $0x6f0] sm:$0xff]  ;;  %v2333_v1 = vld [vmem:[%s5390_s4 + $0x660] sm:$0xff] }
 0x131   :  { %2922 = vmatpush3.msra.mxu1 %v2101_v37  ;;  %2888 = vmatprep.subr.mxu0 %v1893_v56  ;;  %v1911_v49 = vrot.slane %v4985_v53, 7  ;;  %v2496_v34 = vrot.slane %v2495_v19, 4  ;;  %v2523_v31 = vadd.f32 %v2522_v58, %v5077_v9  ;;  %v2481_v51 = vsel %vm161_vm0, %v2460_v57, 0.0  ;;  %v2336_v9 = vld [vmem:[%s5390_s4 + $0x678] sm:$0xff]  ;;  %v2574_v25 = vld [vmem:[%s5390_s4 + $0x7f0] sm:$0xff]  ;;  %v2350_v47 = vld [vmem:[%s5390_s4 + $0x6e8] sm:$0xff] }
 0x132   :  { %1981 = vmatprep.mubr.f32.mxu0 %v1914_v15  ;;  %2923 = vmatprep.subr.mxu1 %v2116_v17  ;;  %3060 = vrcp.f32 %v839_v38  ;;  %v2094_v12 = vmul.f32 %v5038_v28, %v4788_v55  ;;  %v2134_v53 = vrot.slane %v2096_v4, 7  ;;  %v2301_v3 = vrot.slane %v2300_v59, 2  ;;  %v2575_v28 = vld [vmem:[%s5390_s4 + $0x7f8] sm:$0xff]  ;;  %v2335_v26 = vld [vmem:[%s5390_s4 + $0x670] sm:$0xff]  ;;  %v2573_v54 = vld [vmem:[%s5390_s4 + $0x7e8] sm:$0xff] }
 0x133   :  { %2889 = vmatpush3.msra.mxu0 %v1877_v42  ;;  %2924 = vmatpush3.msra.mxu1 %v2100_v62  ;;  %v2259_v40 = vadd.f32 %v2258_v27, %v2257_v33  ;;  %v2286_v32 = vrot.slane %v2285_v6, 4  ;;  %v2482_v36 = vadd.f32 %v2481_v51, %v2480_v13  ;;  %v2509_v50 = vrot.slane %v2508_v30, 4  ;;  %v2559_v15 = vld [vmem:[%s5390_s4 + $0x778] sm:$0xff]  ;;  %v2557_v8 = vld [vmem:[%s5390_s4 + $0x768] sm:$0xff]  ;;  %v2349_v17 = vld [vmem:[%s5390_s4 + $0x6e0] sm:$0xff] }
 0x134   :  { %2890 = vmatprep.subr.mxu0 %v1892_v39  ;;  %2925 = vmatprep.subr.mxu1 %v2115_v2  ;;  %3062 = vrcp.f32 %v841_v43  ;;  %v1912_v55 = vsel %vm1163_vm2, %v1911_v49, %v1871_v48  ;;  %v2497_v52 = vadd.f32 %v2496_v34, %v2495_v19  ;;  %v2524_v63 = vrot.slane %v2523_v31, 2  ;;  %v2572_v57 = vld [vmem:[%s5390_s4 + $0x7e0] sm:$0xff]  ;;  %v2348_v4 = vld [vmem:[%s5390_s4 + $0x6d8] sm:$0xff]  ;;  %v2570_v13 = vld [vmem:[%s5390_s4 + $0x7d0] sm:$0xff] }
 0x135   :  { %2204 = vmatprep.mubr.f32.mxu1 %v2137_v5  ;;  %2891 = vmatpush3.msra.mxu0 %v1876_v41  ;;  %v2135_v16 = vsel %vm1163_vm2, %v2134_v53, %v2094_v12  ;;  %v2275_v14 = vrot.slane %v5124_v46, 2  ;;  %v2302_v29 = vadd.f32 %v2301_v3, %v2300_v59  ;;  %v838_v61 = vadd.f32 1.0, %v4968_v24  ;;  %v2558_v24 = vld [vmem:[%s5390_s4 + $0x770] sm:$0xff]  ;;  %v2556_v62 = vld [vmem:[%s5390_s4 + $0x760] sm:$0xff]  ;;  %v2571_v43 = vld [vmem:[%s5390_s4 + $0x7d8] sm:$0xff] }
 0x136   :  { %2926 = vmatpush3.msra.mxu1 %v2099_v35  ;;  %2892 = vmatprep.subr.mxu0 %v1891_v23  ;;  %v2260_v45 = vrot.slane %v2259_v40, 4  ;;  %v2287_v60 = vadd.f32 %v2286_v32, %v2285_v6  ;;  %v840_v22 = vadd.f32 1.0, %v5025_v0  ;;  %v2483_v37 = vrot.slane %v2482_v36, 4  ;;  %v2334_v0 = vld [vmem:[%s5390_s4 + $0x668] sm:$0xff]  ;;  %v2332_v39 = vld [vmem:[%s5390_s4 + $0x658] sm:$0xff]  ;;  %v2347_v6 = vld [vmem:[%s5390_s4 + $0x6d0] sm:$0xff] }
 0x137   :  { %2927 = vmatprep.subr.mxu1 %v2114_v21  ;;  %2893 = vmatpush3.msra.mxu0 %v1875_v11  ;;  %v2510_v56 = vadd.f32 %v2509_v50, %v2508_v30  ;;  %v2498_v10 = vrot.slane %v2497_v52, 2  ;;  %v2525_v44 = vadd.f32 %v2524_v63, %v2523_v31  ;;  %v2276_v19 = vadd.f32 %v2275_v14, %v5124_v46  ;;  %v2555_v33 = vld [vmem:[%s5390_s4 + $0x758] sm:$0xff]  ;;  %v2331_v30 = vld [vmem:[%s5390_s4 + $0x650] sm:$0xff]  ;;  %v2346_v34 = vld [vmem:[%s5390_s4 + $0x6c8] sm:$0xff] }
 0x138   :  { %2928 = vmatpush3.msra.mxu1 %v2098_v20  ;;  %1982 = vmatmul.mubr.f32.vlgmr.msra.gmra.mxu0 %v1912_v55  ;;  %v2303_v58 = vrot.slane %v2302_v29, 1  ;;  %3064 = vrcp.f32 %v838_v61  ;;  %v2261_v38 = vadd.f32 %v2260_v45, %v2259_v40  ;;  %v2288_v42 = vrot.slane %v2287_v60, 2  ;;  %v2554_v49 = vld [vmem:[%s5390_s4 + $0x750] sm:$0xff]  ;;  %v2569_v21 = vld [vmem:[%s5390_s4 + $0x7c8] sm:$0xff]  ;;  %v2345_v40 = vld [vmem:[%s5390_s4 + $0x6c0] sm:$0xff] }
 0x139   :  { %2205 = vmatmul.mubr.f32.vlgmr.msra.gmra.mxu1 %v2135_v16  ;;  %2932 = vmatprep.subr.mxu0 %v2352_v7  ;;  %3066 = vrcp.f32 %v840_v22  ;;  %v2484_v46 = vadd.f32 %v2483_v37, %v2482_v36  ;;  %v2511_v59 = vrot.slane %v2510_v56, 2  ;;  %v2499_v2 = vadd.f32 %v2498_v10, %v2497_v52  ;;  %v2330_v11 = vld [vmem:[%s5390_s4 + $0x648] sm:$0xff]  ;;  %v2568_v50 = vld [vmem:[%s5390_s4 + $0x7c0] sm:$0xff]  ;;  %v2344_v63 = vld [vmem:[%s5390_s4 + $0x6b8] sm:$0xff] }
 0x13a   :  { %2967 = vmatprep.subr.mxu1 %v2575_v28  ;;  %2933 = vmatpush3.msra.mxu0 %v2336_v9  ;;  %v2526_v48 = vrot.slane %v2525_v44, 1  ;;  %v2277_v5 = vrot.slane %v2276_v19, 1  ;;  %v2304_v41 = vadd.f32 %v2303_v58, %v2302_v29  ;;  %v2262_v35 = vrot.slane %v2261_v38, 2  ;;  %v2553_v20 = vld [vmem:[%s5390_s4 + $0x748] sm:$0xff]  ;;  %v2329_v55 = vld [vmem:[%s5390_s4 + $0x640] sm:$0xff]  ;;  %v2328_v14 = vld [vmem:[%s5390_s4 + $0x638] sm:$0xff] }
 0x13b   :  { %2968 = vmatpush3.msra.mxu1 %v2559_v15  ;;  %2934 = vmatprep.subr.mxu0 %v2351_v18  ;;  %v2289_v23 = vadd.f32 %v2288_v42, %v2287_v60  ;;  %v2485_v31 = vrot.slane %v2484_v46, 2  ;;  %v2512_v51 = vadd.f32 %v2511_v59, %v2510_v56  ;;  %v2500_v12 = vrot.slane %v2499_v2, 1  ;;  %v2552_v52 = vld [vmem:[%s5390_s4 + $0x740] sm:$0xff]  ;;  %v2567_v18 = vld [vmem:[%s5390_s4 + $0x7b8] sm:$0xff]  ;;  %v2343_v45 = vld [vmem:[%s5390_s4 + $0x6b0] sm:$0xff] }
 0x13c   :  { %2969 = vmatprep.subr.mxu1 %v2574_v25  ;;  %2935 = vmatpush3.msra.mxu0 %v2335_v26  ;;  %v2527_v53 = vadd.f32 %v2526_v48, %v2525_v44  ;;  %v2278_v32 = vadd.f32 %v2277_v5, %v2276_v19  ;;  %v2308_v7 = vmul.f32 0.020408163, %v2304_v41  ;;  %v2263_v28 = vadd.f32 %v2262_v35, %v2261_v38  ;;  %v2551_v26 = vld [vmem:[%s5390_s4 + $0x738] sm:$0xff]  ;;  %v2342_v10 = vld [vmem:[%s5390_s4 + $0x6a8] sm:$0xff]  ;;  %v2341_v42 = vld [vmem:[%s5390_s4 + $0x6a0] sm:$0xff] }
 0x13d   :  { %2970 = vmatpush3.msra.mxu1 %v2558_v24  ;;  %2936 = vmatprep.subr.mxu0 %v2350_v47  ;;  %v2290_v9 = vrot.slane %v2289_v23, 1  ;;  %v2486_v16 = vadd.f32 %v2485_v31, %v2484_v46  ;;  %v2513_v15 = vrot.slane %v2512_v51, 1  ;;  %v2501_v29 = vadd.f32 %v2500_v12, %v2499_v2  ;;  %v2566_v24 = vld [vmem:[%s5390_s4 + $0x7b0] sm:$0xff]  ;;  %v2565_v19 = vld [vmem:[%s5390_s4 + $0x7a8] sm:$0xff]  ;;  %v2564_v46 = vld [vmem:[%s5390_s4 + $0x7a0] sm:$0xff] }
 0x13e   :  { %2971 = vmatprep.subr.mxu1 %v2573_v54  ;;  %2937 = vmatpush3.msra.mxu0 %v2334_v0  ;;  %v2531_v61 = vmul.f32 0.020408163, %v2527_v53  ;;  %v2306_v60 = vmul.f32 0.020408163, %v2278_v32  ;;  %v2327_v47 = vld [vmem:[%s5390_s4 + $0x630] sm:$0xff]  ;;  %v2264_v37 = vrot.slane %v2263_v28, 1 }
 0x13f   :  { %2972 = vmatpush3.msra.mxu1 %v2557_v8  ;;  %2938 = vmatprep.subr.mxu0 %v2349_v17  ;;  %v5231_v27 = vpop.eup %3060  ;;  %v2291_v56 = vadd.f32 %v2290_v9, %v2289_v23  ;;  %v2550_v0 = vld [vmem:[%s5390_s4 + $0x730] sm:$0xff]  ;;  %v2487_v44 = vrot.slane %v2486_v16, 1  ;;  %v2514_v8 = vadd.f32 %v2513_v15, %v2512_v51  ;;  %v2326_v58 = vld [vmem:[%s5390_s4 + $0x628] sm:$0xff]  ;;  %v2325_v59 = vld [vmem:[%s5390_s4 + $0x620] sm:$0xff] }
 0x140   :  { %2973 = vmatprep.subr.mxu1 %v2572_v57  ;;  %2939 = vmatpush3.msra.mxu0 %v2333_v1  ;;  %v2312_v36 = vrot.slane %v5231_v27, 1  ;;  %v2529_v57 = vmul.f32 0.020408163, %v2501_v29  ;;  %v2549_v38 = vld [vmem:[%s5390_s4 + $0x728] sm:$0xff]  ;;  %v2548_v48 = vld [vmem:[%s5390_s4 + $0x720] sm:$0xff]  ;;  %v2562_v31 = vld [vmem:[%s5390_s4 + $0x790] sm:$0xff] }
 0x141   :  { %2974 = vmatpush3.msra.mxu1 %v2556_v62  ;;  %2940 = vmatprep.subr.mxu0 %v2348_v4  ;;  %v5251_v3 = vpop.eup %3062  ;;  %v2318_v62 = vmul.f32 %v5231_v27, %v2306_v60  ;;  %v2530_v5 = vmul.f32 0.020408163, %v2514_v8  ;;  %v2563_v27 = vld [vmem:[%s5390_s4 + $0x798] sm:$0xff]  ;;  %v2546_v12 = vld [vmem:[%s5390_s4 + $0x710] sm:$0xff]  ;;  %v2561_v32 = vld [vmem:[%s5390_s4 + $0x788] sm:$0xff] }
 0x142   :  { %2975 = vmatprep.subr.mxu1 %v2571_v43  ;;  %2941 = vmatpush3.msra.mxu0 %v2332_v39  ;;  %v2535_v25 = vrot.slane %v5251_v3, 1  ;;  %v2320_v22 = vmul.f32 %v2312_v36, %v2308_v7  ;;  %v2265_v43 = vadd.f32 %v2264_v37, %v2263_v28  ;;  %v2307_v39 = vmul.f32 0.020408163, %v2291_v56  ;;  %v2322_v7 = vld [vmem:[%s5390_s4 + $0x608] sm:$0xff]  ;;  %v2560_v9 = vld [vmem:[%s5390_s4 + $0x780] sm:$0xff] }
 0x143   :  { %2976 = vmatpush3.msra.mxu1 %v2555_v33  ;;  %2942 = vmatprep.subr.mxu0 %v2347_v6  ;;  %v2340_v33 = vld [vmem:[%s5390_s4 + $0x698] sm:$0xff]  ;;  %v2488_v6 = vadd.f32 %v2487_v44, %v2486_v16  ;;  %v2545_v36 = vld [vmem:[%s5390_s4 + $0x708] sm:$0xff]  ;;  %v2544_v15 = vld [vmem:[%s5390_s4 + $0x700] sm:$0xff] }
 0x144   :  { %2977 = vmatprep.subr.mxu1 %v2570_v13  ;;  %2943 = vmatpush3.msra.mxu0 %v2331_v30  ;;  %v2543_v1 = vmul.f32 %v2535_v25, %v2531_v61  ;;  %v2359_v4 = vrot.slane %v2320_v22, 7  ;;  %v2324_v13 = vld [vmem:[%s5390_s4 + $0x618] sm:$0xff]  ;;  %v2541_v30 = vmul.f32 %v5251_v3, %v2529_v57  ;;  %v2305_v51 = vmul.f32 0.020408163, %v2265_v43 }
 0x145   :  { %2978 = vmatpush3.msra.mxu1 %v2554_v49  ;;  %2944 = vmatprep.subr.mxu0 %v2346_v34  ;;  %v5291_v54 = vpop.eup %3064  ;;  %v2547_v49 = vld [vmem:[%s5390_s4 + $0x718] sm:$0xff]  ;;  %v2339_v34 = vld [vmem:[%s5390_s4 + $0x690] sm:$0xff]  ;;  %v2528_v53 = vmul.f32 0.020408163, %v2488_v6 }
 0x146   :  { %2979 = vmatprep.subr.mxu1 %v2569_v21  ;;  %2945 = vmatpush3.msra.mxu0 %v2330_v11  ;;  %v5299_v17 = vpop.eup %3066  ;;  %v2311_v2 = vrot.slane %v5291_v54, 1  ;;  %v2582_v35 = vrot.slane %v2543_v1, 7  ;;  %v2360_v23 = vsel %vm1163_vm2, %v2359_v4, %v2318_v62  ;;  %v2323_v11 = vld [vmem:[%s5390_s4 + $0x610] sm:$0xff] }
 0x147   :  { %2980 = vmatpush3.msra.mxu1 %v2553_v20  ;;  %2946 = vmatprep.subr.mxu0 %v2345_v40  ;;  %v2534_v41 = vrot.slane %v5299_v17, 1  ;;  %v2338_v40 = vld [vmem:[%s5390_s4 + $0x688] sm:$0xff] }
 0x148   :  { %2981 = vmatprep.subr.mxu1 %v2568_v50  ;;  %2947 = vmatpush3.msra.mxu0 %v2329_v55  ;;  %v2319_v21 = vmul.f32 %v2311_v2, %v2307_v39  ;;  %v2583_v20 = vsel %vm1163_vm2, %v2582_v35, %v2541_v30  ;;  %v2337_v50 = vld [vmem:[%s5390_s4 + $0x680] sm:$0xff]  ;;  %v2317_v55 = vmul.f32 %v5291_v54, %v2305_v51 }
 0x149   :  { %2982 = vmatpush3.msra.mxu1 %v2552_v52  ;;  %2948 = vmatprep.subr.mxu0 %v2344_v63  ;;  %v2542_v3 = vmul.f32 %v2534_v41, %v2530_v5  ;;  %v2321_v52 = vld [vmem:[%s5390_s4 + $0x600] sm:$0xff]  ;;  %v2540_v63 = vmul.f32 %v5299_v17, %v2528_v53 }
 0x14a   :  { %2983 = vmatprep.subr.mxu1 %v2567_v18  ;;  %2949 = vmatpush3.msra.mxu0 %v2328_v14  ;;  %v2357_v28 = vrot.slane %v2319_v21, 7 }
 0x14b   :  { %2984 = vmatpush3.msra.mxu1 %v2551_v26  ;;  %2950 = vmatprep.subr.mxu0 %v2343_v45  ;;  %v2580_v16 = vrot.slane %v2542_v3, 7 }
 0x14c   :  { %2985 = vmatprep.subr.mxu1 %v2566_v24  ;;  %2951 = vmatpush3.msra.mxu0 %v2327_v47  ;;  %v2358_v18 = vsel %vm1163_vm2, %v2357_v28, %v2317_v55 }
 0x14d   :  { %2986 = vmatpush3.msra.mxu1 %v2550_v0  ;;  %2952 = vmatprep.subr.mxu0 %v2342_v10  ;;  %v2581_v14 = vsel %vm1163_vm2, %v2580_v16, %v2540_v63 }
 0x14e   :  { %2987 = vmatprep.subr.mxu1 %v2565_v19  ;;  %2953 = vmatpush3.msra.mxu0 %v2326_v58 }
 0x14f   :  { %2988 = vmatpush3.msra.mxu1 %v2549_v38  ;;  %2954 = vmatprep.subr.mxu0 %v2341_v42 }
 0x150   :  { %2989 = vmatprep.subr.mxu1 %v2564_v46  ;;  %2955 = vmatpush3.msra.mxu0 %v2325_v59 }
 0x151   :  { %2990 = vmatpush3.msra.mxu1 %v2548_v48  ;;  %2956 = vmatprep.subr.mxu0 %v2340_v33  ;;  %v2721_v48 = vld [vmem:[%s5391_s5] ss:$0 sm:$0xff] }
 0x152   :  { %2991 = vmatprep.subr.mxu1 %v2563_v27  ;;  %2957 = vmatpush3.msra.mxu0 %v2324_v13 }
 0x153   :  { %2427 = vmatprep.mubr.f32.mxu0 %v2360_v23  ;;  %2992 = vmatpush3.msra.mxu1 %v2547_v49 }
 0x154   :  { %2958 = vmatprep.subr.mxu0 %v2339_v34  ;;  %2993 = vmatprep.subr.mxu1 %v2562_v31 }
 0x155   :  { %2959 = vmatpush3.msra.mxu0 %v2323_v11  ;;  %2994 = vmatpush3.msra.mxu1 %v2546_v12 }
 0x156   :  { %2650 = vmatprep.mubr.f32.mxu1 %v2583_v20  ;;  %2960 = vmatprep.subr.mxu0 %v2338_v40 }
 0x157   :  { %2995 = vmatprep.subr.mxu1 %v2561_v32  ;;  %2961 = vmatpush3.msra.mxu0 %v2322_v7 }
 0x158   :  { %2996 = vmatpush3.msra.mxu1 %v2545_v36  ;;  %2962 = vmatprep.subr.mxu0 %v2337_v50 }
 0x159   :  { %2997 = vmatprep.subr.mxu1 %v2560_v9  ;;  %2963 = vmatpush3.msra.mxu0 %v2321_v52 }
 0x15a   :  { %2998 = vmatpush3.msra.mxu1 %v2544_v15  ;;  %2428 = vmatmul.mubr.f32.vlgmr.msra.gmra.mxu0 %v2358_v18 }
 0x15b   :  { %2651 = vmatmul.mubr.f32.vlgmr.msra.gmra.mxu1 %v2581_v14 }
 0x1b5   :  { %v2789_v61 = vpop.f32.mrf.mxu1 }
 0x1b6   :  { %v2754_v29 = vpop.f32.mrf.mxu0 }
 0x1b7   :  { %v2790_v45 = vpop.f32.mrf.mxu1 }
 0x1b8   :  { %v2755_v25 = vpop.f32.mrf.mxu0  ;;  %v2791_v24 = vadd.f32 %v2790_v45, %v2789_v61 }
 0x1b9   :  { %v2756_v22 = vadd.f32 %v2755_v25, %v2754_v29 }
 0x1bb   :  { %v1316_v54 = vadd.f32 %v2791_v24, %v2756_v22 }
 0x1d6   :  { %v2824_v26 = vpop.f32.mrf.mxu0 }
 0x1d7   :  { %v2859_v47 = vpop.f32.mrf.mxu1 }
 0x1d8   :  { %v2825_v60 = vpop.f32.mrf.mxu0 }
 0x1d9   :  { %v2826_v56 = vadd.f32 %v2825_v60, %v2824_v26  ;;  %v2860_v0 = vpop.f32.mrf.mxu1 }
 0x1da   :  { %v2861_v17 = vadd.f32 %v2860_v0, %v2859_v47 }
 0x1db   :  { %v1541_v44 = vadd.f32 %v2826_v56, %v1316_v54 }
 0x1dd   :  { %v1764_v58 = vadd.f32 %v2861_v17, %v1541_v44 }
 0x1f8   :  { %v2894_v37 = vpop.f32.mrf.mxu0 }
 0x1f9   :  { %v2929_v8 = vpop.f32.mrf.mxu1 }
 0x1fa   :  { %v2895_v10 = vpop.f32.mrf.mxu0 }
 0x1fb   :  { %v2896_v19 = vadd.f32 %v2895_v10, %v2894_v37  ;;  %v2930_v57 = vpop.f32.mrf.mxu1 }
 0x1fc   :  { %v2931_v42 = vadd.f32 %v2930_v57, %v2929_v8 }
 0x1fd   :  { %v1987_v1 = vadd.f32 %v2896_v19, %v1764_v58 }
 0x1ff   :  { %v2210_v46 = vadd.f32 %v2931_v42, %v1987_v1 }
 0x21a   :  { %v2964_v38 = vpop.f32.mrf.mxu0 }
 0x21b   :  { %v2999_v62 = vpop.f32.mrf.mxu1 }
 0x21c   :  { %v2965_v4 = vpop.f32.mrf.mxu0 }
 0x21d   :  { %v2966_v59 = vadd.f32 %v2965_v4, %v2964_v38  ;;  %v3000_v43 = vpop.f32.mrf.mxu1 }
 0x21e   :  { %v3001_v2 = vadd.f32 %v3000_v43, %v2999_v62 }
 0x21f   :  { %v2433_v39 = vadd.f32 %v2966_v59, %v2210_v46 }
 0x221   :  { %v2656_v33 = vadd.f32 %v3001_v2, %v2433_v39 }
 0x223   :  { %v2664_v6 = vadd.f32 %v2721_v48, %v2656_v33 }
 0x225   :  { %2666 = vst.msk [vmem:[#allocation2] sm:$0x3] %vm2665_vm3, %v2664_v6 }
 0x226   :  { %3079 = shalt.err (!%p3076_p4)
}
 0x227   :  { %2676 = dma.vmem_to_hbm [thread:$0]  %s2674_s8, 32, %s5392_s6, [#allocation3]  }
 0x228   :  { %3088 = dma.done.wait [#allocation3], 32  }
 0x229   :  { %3089 = vsyncadd [#allocation3], 4294967264 }
 0x22a   :  { %2680 = vsyncpa [#allocation3], 1 }

</bundles_post_ra>
